<compile_context>
chip_gen: v7x
topology: tpu7x:2x2x1
jax: 0.10.0
libtpu: 0.0.40
codegen_flags: <defaults>
</compile_context>

<pallas_src>
import functools

import jax
import jax.numpy as jnp
from jax import lax
from jax.experimental import pallas as pl
from jax.experimental.pallas import tpu as pltpu


def rcab_kernel(x_ref, wc_ref, bc_ref, w1_ref, b1_ref, w2_ref, b2_ref,
                o_ref, pad_ref, *, W, PADL):
    # x_ref   : (B, C, H*W) f32      images; channels on sublanes, H*W on lanes
    # wc_ref  : (9, C, C)   mm dtype shared 3x3 conv weight, one (C,C) per tap
    # bc_ref  : (C, 1)      f32      shared conv bias
    # w1_ref  : (C, Cr) f32, b1_ref : (1, Cr) f32   CA squeeze (transposed)
    # w2_ref  : (C, Cr) f32, b2_ref : (C, 1)  f32   CA excite
    # o_ref   : (B, C, H*W) f32
    # pad_ref : (C, PADL + H*W + PADL) scratch dtype, flat zero-haloed scratch
    B, C, HW = x_ref.shape
    mm_dtype = wc_ref.dtype
    sc_dtype = pad_ref.dtype

    # ---- hoisted constants: built once per grid step, shared by both convs
    # ---- and every image in this block.
    zeros_halo = jnp.zeros((C, PADL), sc_dtype)
    zero_sc = jnp.zeros((), sc_dtype)
    j_idx = lax.broadcasted_iota(jnp.int32, (1, HW), 1) % W
    mask_l = j_idx >= 1            # valid lanes for the dw = -1 column tap
    mask_r = j_idx <= W - 2        # valid lanes for the dw = +1 column tap
    bc = bc_ref[...]
    w1 = w1_ref[...]
    b1 = b1_ref[...]
    w2 = w2_ref[...]
    b2 = b2_ref[...]

    # Halo strips are zeroed once per grid step (they are never overwritten);
    # done unconditionally so megacore grid partitioning stays correct.
    pad_ref[:, :PADL] = zeros_halo
    pad_ref[:, PADL + HW:] = zeros_halo

    def conv3x3(img_f32):
        # Write the conv input into the lane-aligned scratch interior, then
        # accumulate nine (C, C) x (C, HW) MXU products whose taps are read
        # straight from the scratch (no im2col buffer). In the flat row-major
        # layout the +/-1 column taps wrap across image rows -> masked; the
        # +/-W row taps fall into the zero halo automatically.
        pad_ref[:, PADL:PADL + HW] = img_f32.astype(sc_dtype)
        acc = None
        for dh in range(3):
            for dw in range(3):
                t = dh * 3 + dw
                start = PADL + (dh - 1) * W + (dw - 1)
                tap = pad_ref[:, start:start + HW]            # (C, HW)
                if dw == 0:
                    tap = jnp.where(mask_l, tap, zero_sc)
                elif dw == 2:
                    tap = jnp.where(mask_r, tap, zero_sc)
                if tap.dtype != mm_dtype:
                    tap = tap.astype(mm_dtype)
                part = jnp.dot(wc_ref[t], tap,
                               preferred_element_type=jnp.float32)
                acc = part if acc is None else acc + part
        return acc + bc                                       # (C, HW) f32

    for b in range(B):                 # B is a small compile-time block size
        x_img = x_ref[b]                                      # (C, HW) f32

        # ---- conv #1 (3x3, same padding) + ReLU ----
        h1 = jnp.maximum(conv3x3(x_img), 0.0)

        # ---- conv #2 (weights shared with conv #1) ----
        r = conv3x3(h1)

        # ---- channel attention (squeeze/excite, VPU + lane/sublane reduces) --
        y = jnp.mean(r, axis=1, keepdims=True)                # (C, 1)
        z = jnp.maximum(
            jnp.sum(w1 * y, axis=0, keepdims=True) + b1, 0.0)  # (1, Cr)
        s = jax.nn.sigmoid(
            jnp.sum(w2 * z, axis=1, keepdims=True) + b2)       # (C, 1)

        # ---- rescale + residual add (residual from x_ref, full f32) ----
        o_ref[b] = (r * s + x_img).astype(o_ref.dtype)


def rcab_forward(x_nchw, w_conv, b_conv, w_du1, b_du1, w_du2, b_du2,
                 matmul_dtype=jnp.bfloat16, scratch_dtype=None,
                 images_per_block=1, vmem_limit_bytes=None):
    """x_nchw: (N, C, H, W) float32.  Weights are given in PyTorch layouts.

    matmul_dtype  : dtype of the MXU conv operands (bf16 recommended on
                    v6e/v7x); accumulation is always f32 and all element-wise
                    CA / residual math is f32.
    scratch_dtype : dtype of the padded VMEM scratch (defaults to matmul_dtype;
                    pass jnp.float32 on v5e where the VPU has no native bf16).
    images_per_block : images processed per grid step (amortizes per-step
                    overhead in the small-image regime).  Must divide N.
    vmem_limit_bytes : optional raise of the scoped VMEM limit (useful on v6e
                    when running production-size images as one block).
    """
    N, C, H, W = x_nchw.shape
    HW = H * W
    Cr = w_du1.shape[0]
    if scratch_dtype is None:
        scratch_dtype = matmul_dtype
    B = int(images_per_block)
    assert N % B == 0, "images_per_block must divide the batch size"

    # (N, C, H, W) -> (N, C, H*W): free reshape; no transpose / pad HBM passes.
    x = x_nchw.reshape(N, C, HW).astype(jnp.float32)

    # conv weight (Cout, Cin, 3, 3) -> (3, 3, Cout, Cin) -> (9, Cout, Cin);
    # wc[t] with t = dh*3 + dw is the (C, C) map for that tap.
    wc = jnp.transpose(w_conv, (2, 3, 0, 1)).reshape(9, C, C).astype(matmul_dtype)
    bc = b_conv.reshape(C, 1).astype(jnp.float32)
    # CA 1x1 convs as small dense maps (kept f32, computed on the VPU).
    w1 = jnp.transpose(w_du1[:, :, 0, 0], (1, 0)).astype(jnp.float32)   # (C, Cr)
    b1 = b_du1.reshape(1, Cr).astype(jnp.float32)
    w2 = w_du2[:, :, 0, 0].astype(jnp.float32)                          # (C, Cr)
    b2 = b_du2.reshape(C, 1).astype(jnp.float32)

    # Lane-aligned halo: left offset (and right pad) rounded up to 128 lanes so
    # the interior store and the production-size (W=128) row taps are unmasked.
    pad_side = -(-(W + 1) // 128) * 128
    scratch_w = pad_side + HW + pad_side

    mm_bytes = jnp.dtype(matmul_dtype).itemsize
    cost = pl.CostEstimate(
        flops=int(N * (2 * 2 * 9 * C * C * HW + 4 * C * Cr + 6 * C * HW)),
        transcendentals=int(N * C),
        bytes_accessed=int(2 * N * C * HW * 4 + 9 * C * C * mm_bytes
                           + (2 * C * Cr + Cr + 3 * C) * 4),
    )

    kernel = functools.partial(rcab_kernel, W=W, PADL=pad_side)
    out = pl.pallas_call(
        kernel,
        out_shape=jax.ShapeDtypeStruct((N, C, HW), jnp.float32),
        grid=(N // B,),
        in_specs=[
            pl.BlockSpec((B, C, HW), lambda n: (n, 0, 0)),
            pl.BlockSpec((9, C, C), lambda n: (0, 0, 0)),
            pl.BlockSpec((C, 1), lambda n: (0, 0)),
            pl.BlockSpec((C, Cr), lambda n: (0, 0)),
            pl.BlockSpec((1, Cr), lambda n: (0, 0)),
            pl.BlockSpec((C, Cr), lambda n: (0, 0)),
            pl.BlockSpec((C, 1), lambda n: (0, 0)),
        ],
        out_specs=pl.BlockSpec((B, C, HW), lambda n: (n, 0, 0)),
        scratch_shapes=[pltpu.VMEM((C, scratch_w), scratch_dtype)],
        compiler_params=pltpu.CompilerParams(
            dimension_semantics=("parallel",),
            vmem_limit_bytes=vmem_limit_bytes),
        cost_estimate=cost,
    )(x, wc, bc, w1, b1, w2, b2)

    # TODO(synk): for production-sized images on v7x (64 MiB VMEM) add an
    # H-strip grid axis with a 1-row halo (recomputing the h1 halo rows per
    # strip) plus a strip-wise accumulation of the CA channel means.
    return out.reshape(N, C, H, W)


def rcab_reference(x_nchw, w_conv, b_conv, w_du1, b_du1, w_du2, b_du2):
    """Pure-JAX reference matching the PyTorch forward (NCHW)."""
    def conv2d(x, w, b, pad):
        y = lax.conv_general_dilated(
            x, w, window_strides=(1, 1), padding=[(pad, pad), (pad, pad)],
            dimension_numbers=('NCHW', 'OIHW', 'NCHW'))
        return y + b.reshape(1, -1, 1, 1)

    h = jnp.maximum(conv2d(x_nchw, w_conv, b_conv, 1), 0.0)
    r = conv2d(h, w_conv, b_conv, 1)
    y = jnp.mean(r, axis=(2, 3), keepdims=True)
    y = jnp.maximum(conv2d(y, w_du1, b_du1, 0), 0.0)
    s = jax.nn.sigmoid(conv2d(y, w_du2, b_du2, 0))
    return r * s + x_nchw


if __name__ == "__main__":
    # Small, module-consistent shapes: batch=2, n_feat=16, H=W=16,
    # kernel_size=3, reduction=4.
    N, C, H, W = 2, 16, 16, 16
    RED = 4
    Cr = C // RED

    key = jax.random.PRNGKey(0)
    k = jax.random.split(key, 8)
    x = jax.random.normal(k[0], (N, C, H, W), jnp.float32)

    # Deterministic synthetic parameters (PyTorch layouts).
    w_conv = 0.05 * jax.random.normal(k[1], (C, C, 3, 3), jnp.float32)
    b_conv = 0.05 * jax.random.normal(k[2], (C,), jnp.float32)
    w_du1 = 0.1 * jax.random.normal(k[3], (Cr, C, 1, 1), jnp.float32)
    b_du1 = 0.1 * jax.random.normal(k[4], (Cr,), jnp.float32)
    w_du2 = 0.1 * jax.random.normal(k[5], (C, Cr, 1, 1), jnp.float32)
    b_du2 = 0.1 * jax.random.normal(k[6], (C,), jnp.float32)

    ref = jax.block_until_ready(
        rcab_reference(x, w_conv, b_conv, w_du1, b_du1, w_du2, b_du2))

    # Exact-math check (f32 MXU operands, f32 scratch, one image per step).
    out_f32 = jax.block_until_ready(
        rcab_forward(x, w_conv, b_conv, w_du1, b_du1, w_du2, b_du2,
                     matmul_dtype=jnp.float32, images_per_block=1))
    assert out_f32.shape == (N, C, H, W)
    assert jnp.max(jnp.abs(out_f32 - ref)) < 1e-4, "f32 kernel mismatch"

    # Performance default (bf16 operands + bf16 scratch, batched block):
    # operand rounding (~2^-8 relative) over the 9*C contraction bounds the
    # error well below 5e-2 against the f32 reference.
    out_bf16 = jax.block_until_ready(
        rcab_forward(x, w_conv, b_conv, w_du1, b_du1, w_du2, b_du2,
                     matmul_dtype=jnp.bfloat16, images_per_block=2))
    assert out_bf16.shape == (N, C, H, W)
    assert jnp.max(jnp.abs(out_bf16 - ref)) < 5e-2, "bf16 kernel mismatch"

    # v5e-style configuration: f32 scratch / VPU selects, bf16 MXU operands.
    out_v5e = jax.block_until_ready(
        rcab_forward(x, w_conv, b_conv, w_du1, b_du1, w_du2, b_du2,
                     matmul_dtype=jnp.bfloat16, scratch_dtype=jnp.float32,
                     images_per_block=2))
    assert jnp.max(jnp.abs(out_v5e - ref)) < 5e-2, "f32-scratch kernel mismatch"

    print("KERNEL_OK")
</pallas_src>

<mosaic_0001>
module attributes {stable_mosaic.version = 11 : i64} {
  func.func @rcab_kernel(%arg0: i32, %arg1: memref<1x16x256xf32, #tpu.memory_space<vmem>>, %arg2: memref<9x16x16xf32, #tpu.memory_space<vmem>>, %arg3: memref<16x1xf32, #tpu.memory_space<vmem>>, %arg4: memref<16x4xf32, #tpu.memory_space<vmem>>, %arg5: memref<1x4xf32, #tpu.memory_space<vmem>>, %arg6: memref<16x4xf32, #tpu.memory_space<vmem>>, %arg7: memref<16x1xf32, #tpu.memory_space<vmem>>, %arg8: memref<1x16x256xf32, #tpu.memory_space<vmem>>, %arg9: memref<16x512xf32, #tpu.memory_space<vmem>>) attributes {dimension_semantics = [#tpu.dimension_semantics<parallel>], iteration_bounds = array<i64: 2>, scalar_prefetch = 0 : i64, scratch_operands = 1 : i64, tpu.core_type = #tpu.core_type<tc>, window_params = [{transform_indices = @transform_0, window_bounds = array<i64: 1, 16, 256>}, {pipeline_mode = #tpu.pipeline_mode<synchronous>, transform_indices = @transform_1, window_bounds = array<i64: 9, 16, 16>}, {pipeline_mode = #tpu.pipeline_mode<synchronous>, transform_indices = @transform_2, window_bounds = array<i64: 16, 1>}, {pipeline_mode = #tpu.pipeline_mode<synchronous>, transform_indices = @transform_3, window_bounds = array<i64: 16, 4>}, {pipeline_mode = #tpu.pipeline_mode<synchronous>, transform_indices = @transform_4, window_bounds = array<i64: 1, 4>}, {pipeline_mode = #tpu.pipeline_mode<synchronous>, transform_indices = @transform_5, window_bounds = array<i64: 16, 4>}, {pipeline_mode = #tpu.pipeline_mode<synchronous>, transform_indices = @transform_6, window_bounds = array<i64: 16, 1>}, {transform_indices = @transform_7, window_bounds = array<i64: 1, 16, 256>}]} {
    %cst = arith.constant 0.000000e+00 : f32
    %0 = vector.broadcast %cst : f32 to vector<16x128xf32>
    %1 = tpu.iota {dimensions = array<i32: 1>} : vector<1x256xi32>
    %c16_i32 = arith.constant 16 : i32
    %c0_i32 = arith.constant 0 : i32
    %2 = arith.cmpi eq, %c16_i32, %c0_i32 : i32
    %c1_i32 = arith.constant 1 : i32
    %3 = arith.select %2, %c1_i32, %c16_i32 : i32
    %4 = vector.broadcast %3 : i32 to vector<1x256xi32>
    %5 = arith.remsi %1, %4 : vector<1x256xi32>
    %c0_i32_0 = arith.constant 0 : i32
    %6 = vector.broadcast %c0_i32_0 : i32 to vector<1x256xi32>
    %7 = arith.cmpi ne, %5, %6 : vector<1x256xi32>
    %c0_i32_1 = arith.constant 0 : i32
    %8 = vector.broadcast %c0_i32_1 : i32 to vector<1x256xi32>
    %9 = arith.cmpi slt, %5, %8 : vector<1x256xi32>
    %c0_i32_2 = arith.constant 0 : i32
    %10 = arith.cmpi slt, %3, %c0_i32_2 : i32
    %11 = vector.broadcast %10 : i1 to vector<1x256xi1>
    %12 = vector.broadcast %11 : vector<1x256xi1> to vector<1x256xi1>
    %13 = arith.xori %9, %12 : vector<1x256xi1>
    %14 = arith.andi %13, %7 : vector<1x256xi1>
    %15 = vector.broadcast %3 : i32 to vector<1x256xi32>
    %16 = arith.addi %5, %15 : vector<1x256xi32>
    %17 = arith.select %14, %16, %5 : vector<1x256xi1>, vector<1x256xi32>
    %c1_i32_3 = arith.constant 1 : i32
    %18 = vector.broadcast %c1_i32_3 : i32 to vector<1x256xi32>
    %19 = arith.cmpi sge, %17, %18 : vector<1x256xi32>
    %c14_i32 = arith.constant 14 : i32
    %20 = vector.broadcast %c14_i32 : i32 to vector<1x256xi32>
    %21 = arith.cmpi sle, %17, %20 : vector<1x256xi32>
    %c0 = arith.constant 0 : index
    %c0_4 = arith.constant 0 : index
    %22 = vector.load %arg3[%c0, %c0_4] : memref<16x1xf32, #tpu.memory_space<vmem>>, vector<16x1xf32>
    %c0_5 = arith.constant 0 : index
    %c0_6 = arith.constant 0 : index
    %23 = vector.load %arg4[%c0_5, %c0_6] : memref<16x4xf32, #tpu.memory_space<vmem>>, vector<16x4xf32>
    %c0_7 = arith.constant 0 : index
    %c0_8 = arith.constant 0 : index
    %24 = vector.load %arg5[%c0_7, %c0_8] : memref<1x4xf32, #tpu.memory_space<vmem>>, vector<1x4xf32>
    %c0_9 = arith.constant 0 : index
    %c0_10 = arith.constant 0 : index
    %25 = vector.load %arg6[%c0_9, %c0_10] : memref<16x4xf32, #tpu.memory_space<vmem>>, vector<16x4xf32>
    %c0_11 = arith.constant 0 : index
    %c0_12 = arith.constant 0 : index
    %26 = vector.load %arg7[%c0_11, %c0_12] : memref<16x1xf32, #tpu.memory_space<vmem>>, vector<16x1xf32>
    %c0_13 = arith.constant 0 : index
    %c0_14 = arith.constant 0 : index
    %27 = vector.load %arg9[%c0_13, %c0_14] : memref<16x512xf32, #tpu.memory_space<vmem>>, vector<16x128xf32>
    tpu.vector_store %arg9[%c0_13, %c0_14], %0 {strides = array<i32>} : memref<16x512xf32, #tpu.memory_space<vmem>>, vector<16x128xf32>,
    %c0_15 = arith.constant 0 : index
    %c384 = arith.constant 384 : index
    %28 = vector.load %arg9[%c0_15, %c384] : memref<16x512xf32, #tpu.memory_space<vmem>>, vector<16x128xf32>
    tpu.vector_store %arg9[%c0_15, %c384], %0 {strides = array<i32>} : memref<16x512xf32, #tpu.memory_space<vmem>>, vector<16x128xf32>,
    %c0_16 = arith.constant 0 : index
    %c0_17 = arith.constant 0 : index
    %c0_18 = arith.constant 0 : index
    %29 = vector.load %arg1[%c0_16, %c0_17, %c0_18] : memref<1x16x256xf32, #tpu.memory_space<vmem>>, vector<1x16x256xf32>
    %30 = vector.shape_cast %29 : vector<1x16x256xf32> to vector<16x256xf32>
    %c0_19 = arith.constant 0 : index
    %c128 = arith.constant 128 : index
    %31 = vector.load %arg9[%c0_19, %c128] : memref<16x512xf32, #tpu.memory_space<vmem>>, vector<16x256xf32>
    tpu.vector_store %arg9[%c0_19, %c128], %30 {strides = array<i32>} : memref<16x512xf32, #tpu.memory_space<vmem>>, vector<16x256xf32>,
    %c0_20 = arith.constant 0 : index
    %c111 = arith.constant 111 : index
    %32 = vector.load %arg9[%c0_20, %c111] : memref<16x512xf32, #tpu.memory_space<vmem>>, vector<16x256xf32>
    %cst_21 = arith.constant 0.000000e+00 : f32
    %33 = vector.shape_cast %19 : vector<1x256xi1> to vector<1x256xi1>
    %34 = vector.broadcast %33 : vector<1x256xi1> to vector<16x256xi1>
    %35 = vector.broadcast %cst_21 : f32 to vector<16x256xf32>
    %36 = arith.select %34, %32, %35 : vector<16x256xi1>, vector<16x256xf32>
    %c0_22 = arith.constant 0 : index
    %c0_23 = arith.constant 0 : index
    %c0_24 = arith.constant 0 : index
    %37 = vector.load %arg2[%c0_22, %c0_23, %c0_24] : memref<9x16x16xf32, #tpu.memory_space<vmem>>, vector<1x16x16xf32>
    %38 = vector.shape_cast %37 : vector<1x16x16xf32> to vector<16x16xf32>
    %cst_25 = arith.constant dense<0.000000e+00> : vector<16x256xf32>
    %39 = tpu.matmul %38, %36, %cst_25 {dimension_numbers = #tpu.dot_dimension_numbers<[1], [0], [0], [1], [0, 0, 1, 1], [], []>} : vector<16x16xf32>, vector<16x256xf32>, vector<16x256xf32> -> vector<16x256xf32>
    %c0_26 = arith.constant 0 : index
    %c112 = arith.constant 112 : index
    %40 = vector.load %arg9[%c0_26, %c112] : memref<16x512xf32, #tpu.memory_space<vmem>>, vector<16x256xf32>
    %c1 = arith.constant 1 : index
    %c0_27 = arith.constant 0 : index
    %c0_28 = arith.constant 0 : index
    %41 = vector.load %arg2[%c1, %c0_27, %c0_28] : memref<9x16x16xf32, #tpu.memory_space<vmem>>, vector<1x16x16xf32>
    %42 = vector.shape_cast %41 : vector<1x16x16xf32> to vector<16x16xf32>
    %cst_29 = arith.constant dense<0.000000e+00> : vector<16x256xf32>
    %43 = tpu.matmul %42, %40, %cst_29 {dimension_numbers = #tpu.dot_dimension_numbers<[1], [0], [0], [1], [0, 0, 1, 1], [], []>} : vector<16x16xf32>, vector<16x256xf32>, vector<16x256xf32> -> vector<16x256xf32>
    %44 = arith.addf %39, %43 : vector<16x256xf32>
    %c0_30 = arith.constant 0 : index
    %c113 = arith.constant 113 : index
    %45 = vector.load %arg9[%c0_30, %c113] : memref<16x512xf32, #tpu.memory_space<vmem>>, vector<16x256xf32>
    %cst_31 = arith.constant 0.000000e+00 : f32
    %46 = vector.shape_cast %21 : vector<1x256xi1> to vector<1x256xi1>
    %47 = vector.broadcast %46 : vector<1x256xi1> to vector<16x256xi1>
    %48 = vector.broadcast %cst_31 : f32 to vector<16x256xf32>
    %49 = arith.select %47, %45, %48 : vector<16x256xi1>, vector<16x256xf32>
    %c2 = arith.constant 2 : index
    %c0_32 = arith.constant 0 : index
    %c0_33 = arith.constant 0 : index
    %50 = vector.load %arg2[%c2, %c0_32, %c0_33] : memref<9x16x16xf32, #tpu.memory_space<vmem>>, vector<1x16x16xf32>
    %51 = vector.shape_cast %50 : vector<1x16x16xf32> to vector<16x16xf32>
    %cst_34 = arith.constant dense<0.000000e+00> : vector<16x256xf32>
    %52 = tpu.matmul %51, %49, %cst_34 {dimension_numbers = #tpu.dot_dimension_numbers<[1], [0], [0], [1], [0, 0, 1, 1], [], []>} : vector<16x16xf32>, vector<16x256xf32>, vector<16x256xf32> -> vector<16x256xf32>
    %53 = arith.addf %44, %52 : vector<16x256xf32>
    %c0_35 = arith.constant 0 : index
    %c127 = arith.constant 127 : index
    %54 = vector.load %arg9[%c0_35, %c127] : memref<16x512xf32, #tpu.memory_space<vmem>>, vector<16x256xf32>
    %cst_36 = arith.constant 0.000000e+00 : f32
    %55 = vector.shape_cast %19 : vector<1x256xi1> to vector<1x256xi1>
    %56 = vector.broadcast %55 : vector<1x256xi1> to vector<16x256xi1>
    %57 = vector.broadcast %cst_36 : f32 to vector<16x256xf32>
    %58 = arith.select %56, %54, %57 : vector<16x256xi1>, vector<16x256xf32>
    %c3 = arith.constant 3 : index
    %c0_37 = arith.constant 0 : index
    %c0_38 = arith.constant 0 : index
    %59 = vector.load %arg2[%c3, %c0_37, %c0_38] : memref<9x16x16xf32, #tpu.memory_space<vmem>>, vector<1x16x16xf32>
    %60 = vector.shape_cast %59 : vector<1x16x16xf32> to vector<16x16xf32>
    %cst_39 = arith.constant dense<0.000000e+00> : vector<16x256xf32>
    %61 = tpu.matmul %60, %58, %cst_39 {dimension_numbers = #tpu.dot_dimension_numbers<[1], [0], [0], [1], [0, 0, 1, 1], [], []>} : vector<16x16xf32>, vector<16x256xf32>, vector<16x256xf32> -> vector<16x256xf32>
    %62 = arith.addf %53, %61 : vector<16x256xf32>
    %c0_40 = arith.constant 0 : index
    %c128_41 = arith.constant 128 : index
    %63 = vector.load %arg9[%c0_40, %c128_41] : memref<16x512xf32, #tpu.memory_space<vmem>>, vector<16x256xf32>
    %c4 = arith.constant 4 : index
    %c0_42 = arith.constant 0 : index
    %c0_43 = arith.constant 0 : index
    %64 = vector.load %arg2[%c4, %c0_42, %c0_43] : memref<9x16x16xf32, #tpu.memory_space<vmem>>, vector<1x16x16xf32>
    %65 = vector.shape_cast %64 : vector<1x16x16xf32> to vector<16x16xf32>
    %cst_44 = arith.constant dense<0.000000e+00> : vector<16x256xf32>
    %66 = tpu.matmul %65, %63, %cst_44 {dimension_numbers = #tpu.dot_dimension_numbers<[1], [0], [0], [1], [0, 0, 1, 1], [], []>} : vector<16x16xf32>, vector<16x256xf32>, vector<16x256xf32> -> vector<16x256xf32>
    %67 = arith.addf %62, %66 : vector<16x256xf32>
    %c0_45 = arith.constant 0 : index
    %c129 = arith.constant 129 : index
    %68 = vector.load %arg9[%c0_45, %c129] : memref<16x512xf32, #tpu.memory_space<vmem>>, vector<16x256xf32>
    %cst_46 = arith.constant 0.000000e+00 : f32
    %69 = vector.shape_cast %21 : vector<1x256xi1> to vector<1x256xi1>
    %70 = vector.broadcast %69 : vector<1x256xi1> to vector<16x256xi1>
    %71 = vector.broadcast %cst_46 : f32 to vector<16x256xf32>
    %72 = arith.select %70, %68, %71 : vector<16x256xi1>, vector<16x256xf32>
    %c5 = arith.constant 5 : index
    %c0_47 = arith.constant 0 : index
    %c0_48 = arith.constant 0 : index
    %73 = vector.load %arg2[%c5, %c0_47, %c0_48] : memref<9x16x16xf32, #tpu.memory_space<vmem>>, vector<1x16x16xf32>
    %74 = vector.shape_cast %73 : vector<1x16x16xf32> to vector<16x16xf32>
    %cst_49 = arith.constant dense<0.000000e+00> : vector<16x256xf32>
    %75 = tpu.matmul %74, %72, %cst_49 {dimension_numbers = #tpu.dot_dimension_numbers<[1], [0], [0], [1], [0, 0, 1, 1], [], []>} : vector<16x16xf32>, vector<16x256xf32>, vector<16x256xf32> -> vector<16x256xf32>
    %76 = arith.addf %67, %75 : vector<16x256xf32>
    %c0_50 = arith.constant 0 : index
    %c143 = arith.constant 143 : index
    %77 = vector.load %arg9[%c0_50, %c143] : memref<16x512xf32, #tpu.memory_space<vmem>>, vector<16x256xf32>
    %cst_51 = arith.constant 0.000000e+00 : f32
    %78 = vector.shape_cast %19 : vector<1x256xi1> to vector<1x256xi1>
    %79 = vector.broadcast %78 : vector<1x256xi1> to vector<16x256xi1>
    %80 = vector.broadcast %cst_51 : f32 to vector<16x256xf32>
    %81 = arith.select %79, %77, %80 : vector<16x256xi1>, vector<16x256xf32>
    %c6 = arith.constant 6 : index
    %c0_52 = arith.constant 0 : index
    %c0_53 = arith.constant 0 : index
    %82 = vector.load %arg2[%c6, %c0_52, %c0_53] : memref<9x16x16xf32, #tpu.memory_space<vmem>>, vector<1x16x16xf32>
    %83 = vector.shape_cast %82 : vector<1x16x16xf32> to vector<16x16xf32>
    %cst_54 = arith.constant dense<0.000000e+00> : vector<16x256xf32>
    %84 = tpu.matmul %83, %81, %cst_54 {dimension_numbers = #tpu.dot_dimension_numbers<[1], [0], [0], [1], [0, 0, 1, 1], [], []>} : vector<16x16xf32>, vector<16x256xf32>, vector<16x256xf32> -> vector<16x256xf32>
    %85 = arith.addf %76, %84 : vector<16x256xf32>
    %c0_55 = arith.constant 0 : index
    %c144 = arith.constant 144 : index
    %86 = vector.load %arg9[%c0_55, %c144] : memref<16x512xf32, #tpu.memory_space<vmem>>, vector<16x256xf32>
    %c7 = arith.constant 7 : index
    %c0_56 = arith.constant 0 : index
    %c0_57 = arith.constant 0 : index
    %87 = vector.load %arg2[%c7, %c0_56, %c0_57] : memref<9x16x16xf32, #tpu.memory_space<vmem>>, vector<1x16x16xf32>
    %88 = vector.shape_cast %87 : vector<1x16x16xf32> to vector<16x16xf32>
    %cst_58 = arith.constant dense<0.000000e+00> : vector<16x256xf32>
    %89 = tpu.matmul %88, %86, %cst_58 {dimension_numbers = #tpu.dot_dimension_numbers<[1], [0], [0], [1], [0, 0, 1, 1], [], []>} : vector<16x16xf32>, vector<16x256xf32>, vector<16x256xf32> -> vector<16x256xf32>
    %90 = arith.addf %85, %89 : vector<16x256xf32>
    %c0_59 = arith.constant 0 : index
    %c145 = arith.constant 145 : index
    %91 = vector.load %arg9[%c0_59, %c145] : memref<16x512xf32, #tpu.memory_space<vmem>>, vector<16x256xf32>
    %cst_60 = arith.constant 0.000000e+00 : f32
    %92 = vector.shape_cast %21 : vector<1x256xi1> to vector<1x256xi1>
    %93 = vector.broadcast %92 : vector<1x256xi1> to vector<16x256xi1>
    %94 = vector.broadcast %cst_60 : f32 to vector<16x256xf32>
    %95 = arith.select %93, %91, %94 : vector<16x256xi1>, vector<16x256xf32>
    %c8 = arith.constant 8 : index
    %c0_61 = arith.constant 0 : index
    %c0_62 = arith.constant 0 : index
    %96 = vector.load %arg2[%c8, %c0_61, %c0_62] : memref<9x16x16xf32, #tpu.memory_space<vmem>>, vector<1x16x16xf32>
    %97 = vector.shape_cast %96 : vector<1x16x16xf32> to vector<16x16xf32>
    %cst_63 = arith.constant dense<0.000000e+00> : vector<16x256xf32>
    %98 = tpu.matmul %97, %95, %cst_63 {dimension_numbers = #tpu.dot_dimension_numbers<[1], [0], [0], [1], [0, 0, 1, 1], [], []>} : vector<16x16xf32>, vector<16x256xf32>, vector<16x256xf32> -> vector<16x256xf32>
    %99 = arith.addf %90, %98 : vector<16x256xf32>
    %100 = vector.broadcast %22 : vector<16x1xf32> to vector<16x256xf32>
    %101 = arith.addf %99, %100 : vector<16x256xf32>
    %cst_64 = arith.constant 0.000000e+00 : f32
    %102 = vector.broadcast %cst_64 : f32 to vector<16x256xf32>
    %103 = arith.maximumf %101, %102 : vector<16x256xf32>
    %c0_65 = arith.constant 0 : index
    %c128_66 = arith.constant 128 : index
    %104 = vector.load %arg9[%c0_65, %c128_66] : memref<16x512xf32, #tpu.memory_space<vmem>>, vector<16x256xf32>
    tpu.vector_store %arg9[%c0_65, %c128_66], %103 {strides = array<i32>} : memref<16x512xf32, #tpu.memory_space<vmem>>, vector<16x256xf32>,
    %c0_67 = arith.constant 0 : index
    %c111_68 = arith.constant 111 : index
    %105 = vector.load %arg9[%c0_67, %c111_68] : memref<16x512xf32, #tpu.memory_space<vmem>>, vector<16x256xf32>
    %cst_69 = arith.constant 0.000000e+00 : f32
    %106 = vector.shape_cast %19 : vector<1x256xi1> to vector<1x256xi1>
    %107 = vector.broadcast %106 : vector<1x256xi1> to vector<16x256xi1>
    %108 = vector.broadcast %cst_69 : f32 to vector<16x256xf32>
    %109 = arith.select %107, %105, %108 : vector<16x256xi1>, vector<16x256xf32>
    %c0_70 = arith.constant 0 : index
    %c0_71 = arith.constant 0 : index
    %c0_72 = arith.constant 0 : index
    %110 = vector.load %arg2[%c0_70, %c0_71, %c0_72] : memref<9x16x16xf32, #tpu.memory_space<vmem>>, vector<1x16x16xf32>
    %111 = vector.shape_cast %110 : vector<1x16x16xf32> to vector<16x16xf32>
    %cst_73 = arith.constant dense<0.000000e+00> : vector<16x256xf32>
    %112 = tpu.matmul %111, %109, %cst_73 {dimension_numbers = #tpu.dot_dimension_numbers<[1], [0], [0], [1], [0, 0, 1, 1], [], []>} : vector<16x16xf32>, vector<16x256xf32>, vector<16x256xf32> -> vector<16x256xf32>
    %c0_74 = arith.constant 0 : index
    %c112_75 = arith.constant 112 : index
    %113 = vector.load %arg9[%c0_74, %c112_75] : memref<16x512xf32, #tpu.memory_space<vmem>>, vector<16x256xf32>
    %c1_76 = arith.constant 1 : index
    %c0_77 = arith.constant 0 : index
    %c0_78 = arith.constant 0 : index
    %114 = vector.load %arg2[%c1_76, %c0_77, %c0_78] : memref<9x16x16xf32, #tpu.memory_space<vmem>>, vector<1x16x16xf32>
    %115 = vector.shape_cast %114 : vector<1x16x16xf32> to vector<16x16xf32>
    %cst_79 = arith.constant dense<0.000000e+00> : vector<16x256xf32>
    %116 = tpu.matmul %115, %113, %cst_79 {dimension_numbers = #tpu.dot_dimension_numbers<[1], [0], [0], [1], [0, 0, 1, 1], [], []>} : vector<16x16xf32>, vector<16x256xf32>, vector<16x256xf32> -> vector<16x256xf32>
    %117 = arith.addf %112, %116 : vector<16x256xf32>
    %c0_80 = arith.constant 0 : index
    %c113_81 = arith.constant 113 : index
    %118 = vector.load %arg9[%c0_80, %c113_81] : memref<16x512xf32, #tpu.memory_space<vmem>>, vector<16x256xf32>
    %cst_82 = arith.constant 0.000000e+00 : f32
    %119 = vector.shape_cast %21 : vector<1x256xi1> to vector<1x256xi1>
    %120 = vector.broadcast %119 : vector<1x256xi1> to vector<16x256xi1>
    %121 = vector.broadcast %cst_82 : f32 to vector<16x256xf32>
    %122 = arith.select %120, %118, %121 : vector<16x256xi1>, vector<16x256xf32>
    %c2_83 = arith.constant 2 : index
    %c0_84 = arith.constant 0 : index
    %c0_85 = arith.constant 0 : index
    %123 = vector.load %arg2[%c2_83, %c0_84, %c0_85] : memref<9x16x16xf32, #tpu.memory_space<vmem>>, vector<1x16x16xf32>
    %124 = vector.shape_cast %123 : vector<1x16x16xf32> to vector<16x16xf32>
    %cst_86 = arith.constant dense<0.000000e+00> : vector<16x256xf32>
    %125 = tpu.matmul %124, %122, %cst_86 {dimension_numbers = #tpu.dot_dimension_numbers<[1], [0], [0], [1], [0, 0, 1, 1], [], []>} : vector<16x16xf32>, vector<16x256xf32>, vector<16x256xf32> -> vector<16x256xf32>
    %126 = arith.addf %117, %125 : vector<16x256xf32>
    %c0_87 = arith.constant 0 : index
    %c127_88 = arith.constant 127 : index
    %127 = vector.load %arg9[%c0_87, %c127_88] : memref<16x512xf32, #tpu.memory_space<vmem>>, vector<16x256xf32>
    %cst_89 = arith.constant 0.000000e+00 : f32
    %128 = vector.shape_cast %19 : vector<1x256xi1> to vector<1x256xi1>
    %129 = vector.broadcast %128 : vector<1x256xi1> to vector<16x256xi1>
    %130 = vector.broadcast %cst_89 : f32 to vector<16x256xf32>
    %131 = arith.select %129, %127, %130 : vector<16x256xi1>, vector<16x256xf32>
    %c3_90 = arith.constant 3 : index
    %c0_91 = arith.constant 0 : index
    %c0_92 = arith.constant 0 : index
    %132 = vector.load %arg2[%c3_90, %c0_91, %c0_92] : memref<9x16x16xf32, #tpu.memory_space<vmem>>, vector<1x16x16xf32>
    %133 = vector.shape_cast %132 : vector<1x16x16xf32> to vector<16x16xf32>
    %cst_93 = arith.constant dense<0.000000e+00> : vector<16x256xf32>
    %134 = tpu.matmul %133, %131, %cst_93 {dimension_numbers = #tpu.dot_dimension_numbers<[1], [0], [0], [1], [0, 0, 1, 1], [], []>} : vector<16x16xf32>, vector<16x256xf32>, vector<16x256xf32> -> vector<16x256xf32>
    %135 = arith.addf %126, %134 : vector<16x256xf32>
    %c0_94 = arith.constant 0 : index
    %c128_95 = arith.constant 128 : index
    %136 = vector.load %arg9[%c0_94, %c128_95] : memref<16x512xf32, #tpu.memory_space<vmem>>, vector<16x256xf32>
    %c4_96 = arith.constant 4 : index
    %c0_97 = arith.constant 0 : index
    %c0_98 = arith.constant 0 : index
    %137 = vector.load %arg2[%c4_96, %c0_97, %c0_98] : memref<9x16x16xf32, #tpu.memory_space<vmem>>, vector<1x16x16xf32>
    %138 = vector.shape_cast %137 : vector<1x16x16xf32> to vector<16x16xf32>
    %cst_99 = arith.constant dense<0.000000e+00> : vector<16x256xf32>
    %139 = tpu.matmul %138, %136, %cst_99 {dimension_numbers = #tpu.dot_dimension_numbers<[1], [0], [0], [1], [0, 0, 1, 1], [], []>} : vector<16x16xf32>, vector<16x256xf32>, vector<16x256xf32> -> vector<16x256xf32>
    %140 = arith.addf %135, %139 : vector<16x256xf32>
    %c0_100 = arith.constant 0 : index
    %c129_101 = arith.constant 129 : index
    %141 = vector.load %arg9[%c0_100, %c129_101] : memref<16x512xf32, #tpu.memory_space<vmem>>, vector<16x256xf32>
    %cst_102 = arith.constant 0.000000e+00 : f32
    %142 = vector.shape_cast %21 : vector<1x256xi1> to vector<1x256xi1>
    %143 = vector.broadcast %142 : vector<1x256xi1> to vector<16x256xi1>
    %144 = vector.broadcast %cst_102 : f32 to vector<16x256xf32>
    %145 = arith.select %143, %141, %144 : vector<16x256xi1>, vector<16x256xf32>
    %c5_103 = arith.constant 5 : index
    %c0_104 = arith.constant 0 : index
    %c0_105 = arith.constant 0 : index
    %146 = vector.load %arg2[%c5_103, %c0_104, %c0_105] : memref<9x16x16xf32, #tpu.memory_space<vmem>>, vector<1x16x16xf32>
    %147 = vector.shape_cast %146 : vector<1x16x16xf32> to vector<16x16xf32>
    %cst_106 = arith.constant dense<0.000000e+00> : vector<16x256xf32>
    %148 = tpu.matmul %147, %145, %cst_106 {dimension_numbers = #tpu.dot_dimension_numbers<[1], [0], [0], [1], [0, 0, 1, 1], [], []>} : vector<16x16xf32>, vector<16x256xf32>, vector<16x256xf32> -> vector<16x256xf32>
    %149 = arith.addf %140, %148 : vector<16x256xf32>
    %c0_107 = arith.constant 0 : index
    %c143_108 = arith.constant 143 : index
    %150 = vector.load %arg9[%c0_107, %c143_108] : memref<16x512xf32, #tpu.memory_space<vmem>>, vector<16x256xf32>
    %cst_109 = arith.constant 0.000000e+00 : f32
    %151 = vector.shape_cast %19 : vector<1x256xi1> to vector<1x256xi1>
    %152 = vector.broadcast %151 : vector<1x256xi1> to vector<16x256xi1>
    %153 = vector.broadcast %cst_109 : f32 to vector<16x256xf32>
    %154 = arith.select %152, %150, %153 : vector<16x256xi1>, vector<16x256xf32>
    %c6_110 = arith.constant 6 : index
    %c0_111 = arith.constant 0 : index
    %c0_112 = arith.constant 0 : index
    %155 = vector.load %arg2[%c6_110, %c0_111, %c0_112] : memref<9x16x16xf32, #tpu.memory_space<vmem>>, vector<1x16x16xf32>
    %156 = vector.shape_cast %155 : vector<1x16x16xf32> to vector<16x16xf32>
    %cst_113 = arith.constant dense<0.000000e+00> : vector<16x256xf32>
    %157 = tpu.matmul %156, %154, %cst_113 {dimension_numbers = #tpu.dot_dimension_numbers<[1], [0], [0], [1], [0, 0, 1, 1], [], []>} : vector<16x16xf32>, vector<16x256xf32>, vector<16x256xf32> -> vector<16x256xf32>
    %158 = arith.addf %149, %157 : vector<16x256xf32>
    %c0_114 = arith.constant 0 : index
    %c144_115 = arith.constant 144 : index
    %159 = vector.load %arg9[%c0_114, %c144_115] : memref<16x512xf32, #tpu.memory_space<vmem>>, vector<16x256xf32>
    %c7_116 = arith.constant 7 : index
    %c0_117 = arith.constant 0 : index
    %c0_118 = arith.constant 0 : index
    %160 = vector.load %arg2[%c7_116, %c0_117, %c0_118] : memref<9x16x16xf32, #tpu.memory_space<vmem>>, vector<1x16x16xf32>
    %161 = vector.shape_cast %160 : vector<1x16x16xf32> to vector<16x16xf32>
    %cst_119 = arith.constant dense<0.000000e+00> : vector<16x256xf32>
    %162 = tpu.matmul %161, %159, %cst_119 {dimension_numbers = #tpu.dot_dimension_numbers<[1], [0], [0], [1], [0, 0, 1, 1], [], []>} : vector<16x16xf32>, vector<16x256xf32>, vector<16x256xf32> -> vector<16x256xf32>
    %163 = arith.addf %158, %162 : vector<16x256xf32>
    %c0_120 = arith.constant 0 : index
    %c145_121 = arith.constant 145 : index
    %164 = vector.load %arg9[%c0_120, %c145_121] : memref<16x512xf32, #tpu.memory_space<vmem>>, vector<16x256xf32>
    %cst_122 = arith.constant 0.000000e+00 : f32
    %165 = vector.shape_cast %21 : vector<1x256xi1> to vector<1x256xi1>
    %166 = vector.broadcast %165 : vector<1x256xi1> to vector<16x256xi1>
    %167 = vector.broadcast %cst_122 : f32 to vector<16x256xf32>
    %168 = arith.select %166, %164, %167 : vector<16x256xi1>, vector<16x256xf32>
    %c8_123 = arith.constant 8 : index
    %c0_124 = arith.constant 0 : index
    %c0_125 = arith.constant 0 : index
    %169 = vector.load %arg2[%c8_123, %c0_124, %c0_125] : memref<9x16x16xf32, #tpu.memory_space<vmem>>, vector<1x16x16xf32>
    %170 = vector.shape_cast %169 : vector<1x16x16xf32> to vector<16x16xf32>
    %cst_126 = arith.constant dense<0.000000e+00> : vector<16x256xf32>
    %171 = tpu.matmul %170, %168, %cst_126 {dimension_numbers = #tpu.dot_dimension_numbers<[1], [0], [0], [1], [0, 0, 1, 1], [], []>} : vector<16x16xf32>, vector<16x256xf32>, vector<16x256xf32> -> vector<16x256xf32>
    %172 = arith.addf %163, %171 : vector<16x256xf32>
    %173 = vector.broadcast %22 : vector<16x1xf32> to vector<16x256xf32>
    %174 = arith.addf %172, %173 : vector<16x256xf32>
    %cst_127 = arith.constant dense<0.000000e+00> : vector<16xf32>
    %175 = vector.multi_reduction <add>, %174, %cst_127 [1] : vector<16x256xf32> to vector<16xf32>
    %176 = vector.shape_cast %175 : vector<16xf32> to vector<16x1xf32>
    %cst_128 = arith.constant 2.560000e+02 : f32
    %177 = vector.broadcast %cst_128 : f32 to vector<16x1xf32>
    %178 = arith.divf %176, %177 : vector<16x1xf32>
    %179 = vector.broadcast %178 : vector<16x1xf32> to vector<16x4xf32>
    %180 = arith.mulf %23, %179 : vector<16x4xf32>
    %cst_129 = arith.constant dense<0.000000e+00> : vector<4xf32>
    %181 = vector.multi_reduction <add>, %180, %cst_129 [0] : vector<16x4xf32> to vector<4xf32>
    %182 = vector.shape_cast %181 : vector<4xf32> to vector<1x4xf32>
    %183 = arith.addf %182, %24 : vector<1x4xf32>
    %cst_130 = arith.constant 0.000000e+00 : f32
    %184 = vector.broadcast %cst_130 : f32 to vector<1x4xf32>
    %185 = arith.maximumf %183, %184 : vector<1x4xf32>
    %186 = vector.broadcast %185 : vector<1x4xf32> to vector<16x4xf32>
    %187 = arith.mulf %25, %186 : vector<16x4xf32>
    %cst_131 = arith.constant dense<0.000000e+00> : vector<16xf32>
    %188 = vector.multi_reduction <add>, %187, %cst_131 [1] : vector<16x4xf32> to vector<16xf32>
    %189 = vector.shape_cast %188 : vector<16xf32> to vector<16x1xf32>
    %190 = arith.addf %189, %26 : vector<16x1xf32>
    %191 = arith.negf %190 : vector<16x1xf32>
    %192 = math.exp %191 : vector<16x1xf32>
    %cst_132 = arith.constant 1.000000e+00 : f32
    %193 = vector.broadcast %cst_132 : f32 to vector<16x1xf32>
    %194 = arith.addf %193, %192 : vector<16x1xf32>
    %195 = arith.divf %193, %194 : vector<16x1xf32>
    %196 = vector.broadcast %195 : vector<16x1xf32> to vector<16x256xf32>
    %197 = arith.mulf %174, %196 : vector<16x256xf32>
    %198 = arith.addf %197, %30 : vector<16x256xf32>
    %c0_133 = arith.constant 0 : index
    %c0_134 = arith.constant 0 : index
    %c0_135 = arith.constant 0 : index
    %199 = vector.load %arg8[%c0_133, %c0_134, %c0_135] : memref<1x16x256xf32, #tpu.memory_space<vmem>>, vector<1x16x256xf32>
    %200 = vector.shape_cast %199 : vector<1x16x256xf32> to vector<16x256xf32>
    %201 = vector.shape_cast %198 : vector<16x256xf32> to vector<1x16x256xf32>
    tpu.vector_store %arg8[%c0_133, %c0_134, %c0_135], %201 {strides = array<i32>} : memref<1x16x256xf32, #tpu.memory_space<vmem>>, vector<1x16x256xf32>,
    return
  }
  func.func @transform_0(%arg0: i32) -> (i32, i32, i32) {
    %c0_i32 = arith.constant 0 : i32
    %c0_i32_0 = arith.constant 0 : i32
    %c0_i32_1 = arith.constant 0 : i32
    return %arg0, %c0_i32, %c0_i32_0 : i32, i32, i32
  }
  func.func @transform_1(%arg0: i32) -> (i32, i32, i32) {
    %c0_i32 = arith.constant 0 : i32
    %c0_i32_0 = arith.constant 0 : i32
    %c0_i32_1 = arith.constant 0 : i32
    %c0_i32_2 = arith.constant 0 : i32
    return %c0_i32, %c0_i32_0, %c0_i32_1 : i32, i32, i32
  }
  func.func @transform_2(%arg0: i32) -> (i32, i32) {
    %c0_i32 = arith.constant 0 : i32
    %c0_i32_0 = arith.constant 0 : i32
    %c0_i32_1 = arith.constant 0 : i32
    return %c0_i32, %c0_i32_0 : i32, i32
  }
  func.func @transform_3(%arg0: i32) -> (i32, i32) {
    %c0_i32 = arith.constant 0 : i32
    %c0_i32_0 = arith.constant 0 : i32
    %c0_i32_1 = arith.constant 0 : i32
    return %c0_i32, %c0_i32_0 : i32, i32
  }
  func.func @transform_4(%arg0: i32) -> (i32, i32) {
    %c0_i32 = arith.constant 0 : i32
    %c0_i32_0 = arith.constant 0 : i32
    %c0_i32_1 = arith.constant 0 : i32
    return %c0_i32, %c0_i32_0 : i32, i32
  }
  func.func @transform_5(%arg0: i32) -> (i32, i32) {
    %c0_i32 = arith.constant 0 : i32
    %c0_i32_0 = arith.constant 0 : i32
    %c0_i32_1 = arith.constant 0 : i32
    return %c0_i32, %c0_i32_0 : i32, i32
  }
  func.func @transform_6(%arg0: i32) -> (i32, i32) {
    %c0_i32 = arith.constant 0 : i32
    %c0_i32_0 = arith.constant 0 : i32
    %c0_i32_1 = arith.constant 0 : i32
    return %c0_i32, %c0_i32_0 : i32, i32
  }
  func.func @transform_7(%arg0: i32) -> (i32, i32, i32) {
    %c0_i32 = arith.constant 0 : i32
    %c0_i32_0 = arith.constant 0 : i32
    %c0_i32_1 = arith.constant 0 : i32
    return %arg0, %c0_i32, %c0_i32_0 : i32, i32, i32
  }
}

</mosaic_0001>

<bundles_post_ra>
// kernel: tpu_custom_call.1
= control target key start
LH: loop header
LB: loop body
LE: loop exit
PB: predicated region body
PF: predicated region fallthrough
CT: control target
= control target key end

     0   :  { %12 = vsyncpa [#allocation4], 0  ;;  %s3883_s0 = inlined_call_operand.vmem [shape: f32[2,16,256], index: 0, kind: input, shape index: {}]   ;;  %s3884_s1 = inlined_call_operand.hbm [shape: f32[9,16,16], index: 1, kind: input, shape index: {}]   ;;  %s3885_s2 = inlined_call_operand.vmem [shape: f32[16,1], index: 2, kind: input, shape index: {}]   ;;  %s3886_s3 = inlined_call_operand.vmem [shape: f32[16,4], index: 3, kind: input, shape index: {}]   ;;  %s3887_s4 = inlined_call_operand.vmem [shape: f32[1,4], index: 4, kind: input, shape index: {}]   ;;  %s3888_s5 = inlined_call_operand.vmem [shape: f32[16,4], index: 5, kind: input, shape index: {}]   ;;  %s3889_s6 = inlined_call_operand.vmem [shape: f32[16,1], index: 6, kind: input, shape index: {}]   ;;  %s3890_s7 = inlined_call_operand.hbm [shape: f32[2,16,256], index: 7, kind: output, shape index: {}]  }
   0x1   :  { %13 = vsyncpa [#allocation5], 0 }
   0x2   :  { %15 = vsyncpa [#allocation5 + $0x1], 0  ;;  %s3285_s24 = smov 0   ;;  %s3287_s25 = smov 0  }
   0x3   :  { %s3289_s26 = smov 0   ;;  %s3291_s27 = smov 0  }
   0x4 LB: > { %s3306_s28 = sadd.s32 4294967295, %s3228_s27   ;;  %s2555_s29 = sadd.s32 4294967294, %s3228_s27   ;;  %s3228_s27 = sphi %s3291_s27, %s3918_s27   ;;  %s3224_s26 = sphi %s3289_s26, %s3917_s26   ;;  %s3220_s25 = sphi %s3287_s25, %s3916_s25   ;;  %s3216_s24 = sphi %s3285_s24, %s3915_s24  }
   0x5   : > { %s3310_s30 = sadd.s32 1, %s3228_s27   ;;  %s180_s8 = sadd.s32 1, %s3224_s26 }
   0x6   : > { %s177_s9 = ssub.s32 %s3228_s27, %s3310_s30  ;;  %p190_p0 = scmp.ne.s32.totalorder %s3224_s26, %s3220_s25 }
   0x7   : > { %p178_p1 = scmp.eq.s32.totalorder %s177_s9, 0  ;;  %p191_p2 = scmp.eq.s32.totalorder %s3306_s28, 1 }
   0x8   : > { %p196_p3 = scmp.ne.s32.totalorder %s3220_s25, %s3216_s24  ;;  %p197_p4 = scmp.eq.s32.totalorder %s2555_s29, 1 }
   0x9   : > { %s3321_s10 = scalar_select %p178_p1, %s3224_s26, %s180_s8  }
   0xa   : > { %p3323_p5 = por %p191_p2, %p190_p0  ;;  %p3327_p6 = por %p197_p4, %p196_p3 }
   0xb   : > { %p2556_p7 = scmp.ge.s32.totalorder %s3228_s27, 1  ;;  %p204_p8 = scmp.lt.s32.totalorder %s3228_s27, 3 }
   0xc   : > { %s3894_s11 = scalar_select %p3323_p5, 1, 0 }
   0xd   : > { %s3895_s12 = scalar_select %p3327_p6, 1, 0 }
   0xe   : > { %p3891_p9 = scmp.eq.s32.totalorder %s3306_s28, 0  ;;  %p3334_p10 = pnand %p2556_p7, %p204_p8 }
   0xf   : > { %s3230_s14 = smov [#allocation3]   ;;  %s3134_s19 = scalar_lea.hbm %s3884_s1, 2304 }
  0x10   : > { %s3896_s13 = scalar_select %p3334_p10, 1, 0 }
  0x11   : > { %s216_s15 = sshll.u32 %s3230_s14, 4  ;;  %p2823_p11 = pneg %p3334_p10  ;;  %s217_s15 = int_to_ptr.vmem [resolvable:$true] %s216_s15 }
  0x12   : > { %p3135_p13 = scmp.ne.s32.totalorder %s3884_s1, %s3134_s19  ;;  %p3141_p3 = scmp.lt.u32.totalorder %s3134_s19, %s3884_s1 }
  0x13   : > { %p3342_p12 = pnand %p3891_p9, %p2823_p11 }
  0x15   : > { %p3136_p0 = pneg %p3342_p12 }
  0x17   : > { %p3137_p1 = pnand %p3136_p0, %p3135_p13 }
  0x19   : > { %p3138_p2 = pneg %p3137_p1 }
  0x1b   : > { %p3143_p4 = pnand %p3141_p3, %p3138_p2 }
  0x1d   : > { %3146 = shalt.err (!%p3143_p4)
}
  0x1e   : > { %s3147_s29 = scalar_lea.vmem %s217_s15, 2304  ;;  %p3155_p9 = scmp.lt.s32.totalorder %s217_s15, %s217_s15 }
  0x1f   : > { %p3148_p7 = scmp.ne.s32.totalorder %s217_s15, %s3147_s29  ;;  %p3156_p6 = scmp.lt.s32.totalorder %s3147_s29, %s3147_s29 }
  0x21   : > { %p3150_p8 = pnand %p3148_p7, %p3136_p0  ;;  %p3157_p5 = por %p3156_p6, %p3155_p9 }
  0x23   : > { %p3151_p11 = pneg %p3150_p8 }
  0x25   : > { %p3158_p10 = pnand %p3157_p5, %p3151_p11 }
  0x27   : > { %3161 = shalt.err (!%p3158_p10)
}
  0x28   : > { %s3231_s8 = smov 128   ;;  %s3232_s9 = smov 8  }
  0x29   : > { %2826 = dma.hbm_to_vmem [thread:$0]  (!%p3342_p12), %s3884_s1, 2304, %s217_s15, [#allocation4], %s3231_s8, %s3231_s8, %s3232_s9  }
  0x2a   : > { %p3898_p13 = scmp.ne.s32.totalorder %s3896_s13, 0 }
  0x2b   : > { %p3899_p1 = scmp.eq.s32.totalorder (!%p3898_p13), %s3306_s28, 0 }
  0x2c   : > { %255 = sbr.rel (%p3898_p13) target bundleno = 1373 (0x55d), region = 48 }
  0x33   : > { %3207 = dma.done.wait (%p3899_p1), [#allocation4], 2304   ;;  %p3900_p0 = pmov %p3899_p1 }
  0x34   : > { %p287_p5 = scmp.lt.s32.totalorder %s3306_s28, 1  ;;  %v3233_v0 = vmov 0.0   ;;  %s3234_s18 = smov 16   ;;  %v323_v10 = vld [vmem:[%s3885_s2] sm:$0xff]  ;;  %v324_v11 = vld [vmem:[%s3885_s2 + $0x8] sm:$0xff]  ;;  %v3242_v12 = vmov 0   ;;  %v292_v13 = vlaneseq }
  0x35   : > { %3209 = vsyncadd (%p3900_p0), [#allocation4], 4294964992  ;;  %481 = vmatprep.mubr.f32.mxu0 %v3233_v0  ;;  %1521 = vmatprep.mubr.f32.mxu1 %v3233_v0  ;;  %s3235_s21 = smov 17   ;;  %s3236_s22 = smov 15   ;;  %vm402_vm0 = vcmask 130048   ;;  %vm372_vm1 = vcmask 138240  }
  0x36   : > { %s288_s16 = scalar_select %p287_p5, %s3306_s28, 1  ;;  %2891 = vrot.lane.b32.xlu1 %v3233_v0, %s3234_s18  ;;  %3000 = vset.pattern.permute.xlu0 %v3242_v12  ;;  %v293_v15 = vand.u32 127, %v292_v13  ;;  %vm593_vm4 = vcmask 121856   ;;  %v3450_v51 = vld [vmem:[#allocation3 + $0x10] sm:$0xff]  ;;  %v3475_v62 = vld [vmem:[#allocation3 + $0x18] sm:$0xff]  ;;  %vm708_vm10 = vcmask 7168  }
  0x37   : > { %s3237_s23 = smov 1   ;;  %s3238_s29 = smov 127   ;;  %3001 = vset.pattern.permute.xlu1 %v3242_v12  ;;  %vm925_vm12 = vcmask 1039360   ;;  %vm1040_vm13 = vcmask 924672   ;;  %vm1158_vm14 = vcmask 916480   ;;  %vm1266_vm15 = vcmask 908288  }
  0x38   : > { %s2655_s13 = sshll.u32 %s288_s16, 5  ;;  %s3239_s8 = smov 113   ;;  %v294_v16 = vadd.s32 128, %v293_v15  ;;  %v299_v22 = vand.u32 15, %v293_v15  ;;  %v3488_v15 = vld [vmem:[#allocation3] sm:$0xff] }
  0x39   : > { %s3377_s20 = scalar_lea.vmem %s3883_s0, %s2655_s13  ;;  %s3240_s9 = smov 112  }
  0x3a   : > { %v3380_v1 = vld [vmem:[%s3377_s20] sm:$0xff]  ;;  %v3383_v2 = vld [vmem:[%s3377_s20 + $0x8] sm:$0xff]  ;;  %v3386_v3 = vld [vmem:[%s3377_s20 + $0x10] sm:$0xff]  ;;  %s3241_s14 = smov 111   ;;  %v306_v21 = vand.u32 15, %v294_v16  ;;  %vm3439_vm3 = vcmp.ge.s32.totalorder %v299_v22, 1 }
  0x3b   : > { %v2880_v4 = vpack.i.bf16 %v3383_v2, %v3380_v1  ;;  %v3391_v5 = vld [vmem:[%s3377_s20 + $0x18] sm:$0xff]  ;;  %v2940_v8 = vpack.i.bf16 %v3233_v0, %v3383_v2  ;;  %v2950_v9 = vpack.i.bf16 %v3386_v3, %v3380_v1  ;;  %vm3462_vm6 = vmpackc.low %vm3439_vm3, %vm3439_vm3  ;;  %vm321_vm9 = vcmp.le.s32.totalorder %v299_v22, 14  ;;  %p3913_p9 = scmp.ne.s32.totalorder %s3894_s11, 0  ;;  %s3243_s15 = smov [#allocation6]  }
  0x3c   : > { %v2885_v6 = vpack.i.bf16 %v3391_v5, %v3386_v3  ;;  %v2945_v7 = vpack.i.bf16 %v3233_v0, %v3391_v5  ;;  %vm3435_vm2 = vcmp.ge.s32.totalorder %v306_v21, 1  ;;  %vm322_vm7 = vcmp.le.s32.totalorder %v306_v21, 14  ;;  %vm3490_vm11 = vmpackc.low %vm321_vm9, %vm321_vm9 }
  0x3d   : > { %2881 = vrot.lane.b32.xlu0 %v2880_v4, %s3234_s18  ;;  %2896 = vrot.lane.b32.xlu1 %v2880_v4, %s3235_s21  ;;  %vm3455_vm5 = vmpackc.low %vm3435_vm2, %vm3435_vm2  ;;  %v2679_v33 = vpack.c.bf16 %v3391_v5, %v3383_v2 }
  0x3e   : > { %vm3477_vm8 = vmpackc.low %vm322_vm7, %vm322_vm7 }
  0x41   : > { %2886 = vrot.lane.b32.xlu0 %v2885_v6, %s3234_s18  ;;  %2906 = vrot.lane.b32.xlu1 %v3233_v0, %s3235_s21 }
  0x45   : > { %2901 = vrot.lane.b32.xlu0 %v2885_v6, %s3235_s21  ;;  %2916 = vrot.lane.b32.xlu1 %v2885_v6, %s3236_s22 }
  0x49   : > { %2911 = vrot.lane.b32.xlu0 %v2880_v4, %s3236_s22  ;;  %2926 = vrot.lane.b32.xlu1 %v2880_v4, %s3237_s23 }
  0x4d   : > { %2921 = vrot.lane.b32.xlu0 %v3233_v0, %s3236_s22  ;;  %2936 = vrot.lane.b32.xlu1 %v3233_v0, %s3237_s23 }
  0x51   : > { %2931 = vrot.lane.b32.xlu0 %v2885_v6, %s3237_s23  ;;  %2946 = vrot.lane.b32.xlu1 %v2945_v7, %s3238_s29 }
  0x55   : > { %2941 = vrot.lane.b32.xlu0 %v2940_v8, %s3238_s29  ;;  %2956 = vrot.lane.b32.xlu1 %v2940_v8, %s3239_s8 }
  0x59   : > { %2951 = vrot.lane.b32.xlu0 %v2950_v9, %s3238_s29  ;;  %2966 = vrot.lane.b32.xlu1 %v2950_v9, %s3239_s8 }
  0x5d   : > { %2961 = vrot.lane.b32.xlu0 %v2945_v7, %s3239_s8  ;;  %2976 = vrot.lane.b32.xlu1 %v2945_v7, %s3240_s9 }
  0x61   : > { %2971 = vrot.lane.b32.xlu0 %v2940_v8, %s3240_s9  ;;  %2986 = vrot.lane.b32.xlu1 %v2940_v8, %s3241_s14 }
  0x65   : > { %2981 = vrot.lane.b32.xlu0 %v2950_v9, %s3240_s9  ;;  %2996 = vrot.lane.b32.xlu1 %v2950_v9, %s3241_s14 }
  0x69   : > { %2991 = vrot.lane.b32.xlu0 %v2945_v7, %s3241_s14  ;;  %1376 = vperm.xlu1 %3001, %v324_v11  }
  0x6d   : > { %1371 = vperm.xlu0 %3000, %v323_v10  }
  0xa8   : > { %v2892_v14 = vpop.permute.xlu1 %2891 }
  0xa9   : > { %v2894_v23 = vunpack.i.h.bf16 %v2892_v14  ;;  %v2893_v24 = vunpack.i.l.bf16 %v2892_v14 }
  0xaf   : > { %v2882_v17 = vpop.permute.xlu0 %2881  ;;  %v2897_v18 = vpop.permute.xlu1 %2896 }
  0xb0   : > { %v2884_v19 = vunpack.i.h.bf16 %v2882_v17  ;;  %v2883_v20 = vunpack.i.l.bf16 %v2882_v17  ;;  %v2899_v25 = vunpack.i.h.bf16 %v2897_v18  ;;  %v2898_v26 = vunpack.i.l.bf16 %v2897_v18 }
  0xb2   : > { %v404_v32 = vsel %vm402_vm0, %v2883_v20, %v2884_v19  ;;  %v403_v37 = vsel %vm402_vm0, %v2893_v24, %v2883_v20  ;;  %v374_v39 = vsel %vm372_vm1, %v2898_v26, %v2899_v25  ;;  %v3501_v25 = vld [vmem:[#allocation3 + $0x8] sm:$0xff] }
  0xb3   : > { %v2887_v27 = vpop.permute.xlu0 %2886  ;;  %v2907_v28 = vpop.permute.xlu1 %2906 }
  0xb4   : > { %v2889_v29 = vunpack.i.h.bf16 %v2887_v27  ;;  %v2888_v30 = vunpack.i.l.bf16 %v2887_v27  ;;  %v2908_v31 = vunpack.i.l.bf16 %v2907_v28  ;;  %v2909_v35 = vunpack.i.h.bf16 %v2907_v28 }
  0xb6   : > { %v406_v36 = vsel %vm402_vm0, %v2888_v30, %v2889_v29  ;;  %v405_v38 = vsel %vm402_vm0, %v2894_v23, %v2888_v30  ;;  %v373_v40 = vsel %vm372_vm1, %v2908_v31, %v2898_v26 }
  0xb7   : > { %v2902_v41 = vpop.permute.xlu0 %2901  ;;  %v2657_v42 = vpack.c.bf16 %v406_v36, %v404_v32  ;;  %v2659_v43 = vpack.c.bf16 %v405_v38, %v403_v37  ;;  %v2917_v44 = vpop.permute.xlu1 %2916  ;;  %v3510_v32 = vld [vmem:[#allocation3 + $0x20] sm:$0xff] }
  0xb8   : > { %v2904_v45 = vunpack.i.h.bf16 %v2902_v41  ;;  %v2903_v46 = vunpack.i.l.bf16 %v2902_v41  ;;  %v2919_v47 = vunpack.i.h.bf16 %v2917_v44  ;;  %v2918_v48 = vunpack.i.l.bf16 %v2917_v44 }
  0xb9   : > { %2658 = vmatprep.subr.bf16.mxu0 %v2657_v42  ;;  %v3526_v42 = vld [vmem:[#allocation3 + $0x30] sm:$0xff] }
  0xba   : > { %v375_v49 = vsel %vm372_vm1, %v2909_v35, %v2903_v46  ;;  %v376_v50 = vsel %vm372_vm1, %v2903_v46, %v2904_v45  ;;  %2660 = vmatpush1.bf16.msra.mxu0 %v2659_v43  ;;  %v597_v60 = vsel %vm593_vm4, %v2918_v48, %v2919_v47  ;;  %v2681_v43 = vpack.c.bf16 %v3386_v3, %v3380_v1 }
  0xbb   : > { %v2661_v53 = vpack.c.bf16 %v376_v50, %v374_v39  ;;  %v2664_v54 = vpack.c.bf16 %v375_v49, %v373_v40  ;;  %v2912_v55 = vpop.permute.xlu0 %2911  ;;  %v2927_v57 = vpop.permute.xlu1 %2926  ;;  %v3519_v39 = vld [vmem:[#allocation3 + $0x28] sm:$0xff] }
  0xbc   : > { %v2914_v58 = vunpack.i.h.bf16 %v2912_v55  ;;  %v2913_v59 = vunpack.i.l.bf16 %v2912_v55  ;;  %v2929_v9 = vunpack.i.h.bf16 %v2927_v57  ;;  %v2928_v10 = vunpack.i.l.bf16 %v2927_v57 }
  0xbd   : > { %2564 = vmatmul.mubr.msk.f32.vlgmr.msra.gmra.mrb[0].mxu0 %vm402_vm0, %v3450_v51  ;;  %2663 = vmatprep.subr.msk.bf16.mxu0 %vm3455_vm5, %v2661_v53 }
  0xbe   : > { %v595_v61 = vsel %vm593_vm4, %v2913_v59, %v2914_v58  ;;  %2666 = vmatpush1.bf16.msk.msra.mxu0 %vm3462_vm6, %v2664_v54  ;;  %487 = vmatprep.mubr.f32.mxu0 %v3233_v0  ;;  %v710_v21 = vsel %vm708_vm10, %v2928_v10, %v2929_v9  ;;  %v3533_v54 = vld [vmem:[#allocation3 + $0x38] sm:$0xff] }
  0xbf   : > { %v2667_v4 = vpack.c.bf16 %v597_v60, %v595_v61  ;;  %v2922_v6 = vpop.permute.xlu0 %2921  ;;  %v2937_v11 = vpop.permute.xlu1 %2936  ;;  %v3544_v61 = vld [vmem:[#allocation3 + $0x40] sm:$0xff] }
  0xc0   : > { %v2924_v7 = vunpack.i.h.bf16 %v2922_v6  ;;  %v2923_v8 = vunpack.i.l.bf16 %v2922_v6  ;;  %v2939_v19 = vunpack.i.h.bf16 %v2937_v11  ;;  %v2938_v20 = vunpack.i.l.bf16 %v2937_v11 }
  0xc1   : > { %2565 = vmatmul.mubr.msk.f32.gmra.mrb[2].mxu0 %vm402_vm0, %v3475_v62  ;;  %2669 = vmatprep.subr.msk.bf16.mxu0 %vm3477_vm8, %v2667_v4 }
  0xc2   : > { %v596_v12 = vsel %vm593_vm4, %v2924_v7, %v2918_v48  ;;  %v594_v14 = vsel %vm593_vm4, %v2923_v8, %v2913_v59  ;;  %564 = vmatprep.mubr.f32.mxu0 %v3233_v0  ;;  %v709_v27 = vsel %vm708_vm10, %v2938_v20, %v2928_v10 }
  0xc3   : > { %v2670_v16 = vpack.c.bf16 %v596_v12, %v594_v14  ;;  %v2932_v18 = vpop.permute.xlu0 %2931  ;;  %v2947_v30 = vpop.permute.xlu1 %2946  ;;  %v3551_v14 = vld [vmem:[#allocation3 + $0x48] sm:$0xff] }
  0xc4   : > { %v2934_v22 = vunpack.i.h.bf16 %v2932_v18  ;;  %v2933_v23 = vunpack.i.l.bf16 %v2932_v18  ;;  %v2949_v36 = vunpack.i.h.bf16 %v2947_v30  ;;  %v2948_v37 = vunpack.i.l.bf16 %v2947_v30 }
  0xc5   : > { %2570 = vmatmul.mubr.msk.f32.vlgmr.msra.gmra.mrb[0].mxu0 %vm402_vm0, %v3488_v15 }
  0xc6   : > { %2672 = vmatpush1.bf16.msk.msra.mxu0 %vm3490_vm11, %v2670_v16  ;;  %v712_v24 = vsel %vm708_vm10, %v2933_v23, %v2934_v22  ;;  %570 = vmatprep.mubr.f32.mxu0 %v3233_v0  ;;  %v711_v28 = vsel %vm708_vm10, %v2939_v19, %v2933_v23  ;;  %v929_v5 = vsel %vm925_vm12, %v2948_v37, %v2949_v36  ;;  %v3562_v23 = vld [vmem:[#allocation3 + $0x50] sm:$0xff] }
  0xc7   : > { %v2673_v26 = vpack.c.bf16 %v712_v24, %v710_v21  ;;  %v2942_v29 = vpop.permute.xlu0 %2941  ;;  %v2676_v31 = vpack.c.bf16 %v711_v28, %v709_v27  ;;  %v2957_v40 = vpop.permute.xlu1 %2956 }
  0xc8   : > { %v2944_v34 = vunpack.i.h.bf16 %v2942_v29  ;;  %v2943_v35 = vunpack.i.l.bf16 %v2942_v29  ;;  %v2959_v47 = vunpack.i.h.bf16 %v2957_v40  ;;  %v2958_v48 = vunpack.i.l.bf16 %v2957_v40 }
  0xc9   : > { %2571 = vmatmul.mubr.msk.f32.gmra.mrb[2].mxu0 %vm402_vm0, %v3501_v25  ;;  %2675 = vmatprep.subr.msk.bf16.mxu0 %vm3455_vm5, %v2673_v26 }
  0xca   : > { %679 = vmatprep.mubr.f32.mxu0 %v3233_v0  ;;  %v927_v2 = vsel %vm925_vm12, %v2943_v35, %v2944_v34  ;;  %v1042_v57 = vsel %vm1040_vm13, %v2958_v48, %v2959_v47  ;;  %v3569_v34 = vld [vmem:[#allocation3 + $0x58] sm:$0xff] }
  0xcb   : > { %v2952_v38 = vpop.permute.xlu0 %2951  ;;  %v2683_v44 = vpack.c.bf16 %v929_v5, %v927_v2  ;;  %v2967_v53 = vpop.permute.xlu1 %2966  ;;  %v3578_v5 = vld [vmem:[#allocation3 + $0x60] sm:$0xff] }
  0xcc   : > { %v2954_v45 = vunpack.i.h.bf16 %v2952_v38  ;;  %v2953_v46 = vunpack.i.l.bf16 %v2952_v38  ;;  %v2969_v6 = vunpack.i.h.bf16 %v2967_v53  ;;  %v2968_v7 = vunpack.i.l.bf16 %v2967_v53  ;;  %v3604_v53 = vld [vmem:[#allocation3 + $0x80] sm:$0xff] }
  0xcd   : > { %2576 = vmatmul.mubr.msk.f32.vlgmr.msra.gmra.mrb[0].mxu0 %vm402_vm0, %v3510_v32 }
  0xce   : > { %2678 = vmatpush1.bf16.msk.msra.mxu0 %vm3462_vm6, %v2676_v31  ;;  %685 = vmatprep.mubr.f32.mxu0 %v3233_v0  ;;  %v928_v55 = vsel %vm925_vm12, %v2954_v45, %v2948_v37  ;;  %v926_v1 = vsel %vm925_vm12, %v2953_v46, %v2943_v35  ;;  %v1041_v16 = vsel %vm1040_vm13, %v2968_v7, %v2958_v48  ;;  %v3583_v45 = vld [vmem:[#allocation3 + $0x68] sm:$0xff] }
  0xcf   : > { %2680 = vmatprep.subr.bf16.mxu0 %v2679_v33  ;;  %v2962_v41 = vpop.permute.xlu0 %2961  ;;  %v2977_v59 = vpop.permute.xlu1 %2976  ;;  %v2686_v60 = vpack.c.bf16 %v928_v55, %v926_v1  ;;  %v3609_v55 = vld [vmem:[#allocation3 + $0x88] sm:$0xff] }
  0xd0   : > { %v2964_v49 = vunpack.i.h.bf16 %v2962_v41  ;;  %v2963_v50 = vunpack.i.l.bf16 %v2962_v41  ;;  %v2979_v10 = vunpack.i.h.bf16 %v2977_v59  ;;  %v2978_v11 = vunpack.i.l.bf16 %v2977_v59 }
  0xd1   : > { %2577 = vmatmul.mubr.msk.f32.gmra.mrb[2].mxu0 %vm402_vm0, %v3519_v39 }
  0xd2   : > { %794 = vmatprep.mubr.f32.mxu0 %v3233_v0  ;;  %v1044_v58 = vsel %vm1040_vm13, %v2963_v50, %v2964_v49  ;;  %v1043_v18 = vsel %vm1040_vm13, %v2969_v6, %v2963_v50  ;;  %v1162_v20 = vsel %vm1158_vm14, %v2978_v11, %v2979_v10  ;;  %v3592_v49 = vld [vmem:[#allocation3 + $0x70] sm:$0xff]  ;;  %v3599_v50 = vld [vmem:[#allocation3 + $0x78] sm:$0xff] }
  0xd3   : > { %v2972_v3 = vpop.permute.xlu0 %2971  ;;  %v2689_v4 = vpack.c.bf16 %v1044_v58, %v1042_v57  ;;  %v2692_v22 = vpack.c.bf16 %v1043_v18, %v1041_v16  ;;  %v2987_v24 = vpop.permute.xlu1 %2986 }
  0xd4   : > { %v2974_v8 = vunpack.i.h.bf16 %v2972_v3  ;;  %v2973_v9 = vunpack.i.l.bf16 %v2972_v3  ;;  %v2989_v29 = vunpack.i.h.bf16 %v2987_v24  ;;  %v2988_v30 = vunpack.i.l.bf16 %v2987_v24 }
  0xd5   : > { %2582 = vmatmul.mubr.msk.f32.vlgmr.msra.gmra.mrb[0].mxu0 %vm402_vm0, %v3526_v42 }
  0xd6   : > { %800 = vmatprep.mubr.f32.mxu0 %v3233_v0  ;;  %2682 = vmatpush1.bf16.msra.mxu0 %v2681_v43  ;;  %v1160_v19 = vsel %vm1158_vm14, %v2973_v9, %v2974_v8  ;;  %v1268_v37 = vsel %vm1266_vm15, %v2988_v30, %v2989_v29 }
  0xd7   : > { %2685 = vmatprep.subr.msk.bf16.mxu0 %vm3477_vm8, %v2683_v44  ;;  %v2982_v12 = vpop.permute.xlu0 %2981  ;;  %v2695_v28 = vpack.c.bf16 %v1162_v20, %v1160_v19  ;;  %v2997_v40 = vpop.permute.xlu1 %2996 }
  0xd8   : > { %v2984_v26 = vunpack.i.h.bf16 %v2982_v12  ;;  %v2983_v27 = vunpack.i.l.bf16 %v2982_v12  ;;  %v2999_v43 = vunpack.i.h.bf16 %v2997_v40  ;;  %v2998_v44 = vunpack.i.l.bf16 %v2997_v40 }
  0xd9   : > { %2583 = vmatmul.mubr.msk.f32.gmra.mrb[2].mxu0 %vm402_vm0, %v3533_v54 }
  0xda   : > { %884 = vmatprep.mubr.f32.mxu0 %v3233_v0  ;;  %v1161_v35 = vsel %vm1158_vm14, %v2984_v26, %v2978_v11  ;;  %v1159_v36 = vsel %vm1158_vm14, %v2983_v27, %v2973_v9  ;;  %v1267_v46 = vsel %vm1266_vm15, %v2998_v44, %v2988_v30 }
  0xdb   : > { %v2992_v21 = vpop.permute.xlu0 %2991  ;;  %v2697_v2 = vpack.c.bf16 %v1161_v35, %v1159_v36 }
  0xdc   : > { %v2994_v31 = vunpack.i.h.bf16 %v2992_v21  ;;  %v2993_v33 = vunpack.i.l.bf16 %v2992_v21 }
  0xdd   : > { %2584 = vmatmul.mubr.msk.f32.vlgmr.msra.gmra.mrb[0].mxu0 %vm402_vm0, %v3544_v61 }
  0xde   : > { %2688 = vmatpush1.bf16.msk.msra.mxu0 %vm3490_vm11, %v2686_v60  ;;  %890 = vmatprep.mubr.f32.mxu0 %v3233_v0  ;;  %v1270_v38 = vsel %vm1266_vm15, %v2993_v33, %v2994_v31  ;;  %v1269_v47 = vsel %vm1266_vm15, %v2999_v43, %v2993_v33 }
  0xdf   : > { %2691 = vmatprep.subr.msk.bf16.mxu0 %vm3455_vm5, %v2689_v4  ;;  %v2699_v41 = vpack.c.bf16 %v1270_v38, %v1268_v37  ;;  %v2702_v48 = vpack.c.bf16 %v1269_v47, %v1267_v46 }
  0xe1   : > { %2585 = vmatmul.mubr.msk.f32.gmra.mrb[2].mxu0 %vm402_vm0, %v3551_v14 }
  0xe2   : > { %1011 = vmatprep.mubr.f32.mxu0 %v3233_v0 }
  0xe5   : > { %2590 = vmatmul.mubr.msk.f32.vlgmr.msra.gmra.mrb[0].mxu0 %vm402_vm0, %v3562_v23 }
  0xe6   : > { %2694 = vmatpush1.bf16.msk.msra.mxu0 %vm3462_vm6, %v2692_v22  ;;  %1017 = vmatprep.mubr.f32.mxu0 %v3233_v0 }
  0xe7   : > { %2696 = vmatprep.subr.bf16.mxu0 %v2695_v28 }
  0xe8   : > { %v3617_v60 = vpop.permute.xlu1 %1376 }
  0xe9   : > { %2591 = vmatmul.mubr.msk.f32.gmra.mrb[2].mxu0 %vm402_vm0, %v3569_v34 }
  0xea   : > { %1126 = vmatprep.mubr.f32.mxu0 %v3233_v0 }
  0xec   : > { %v3613_v1 = vpop.permute.xlu0 %1371 }
  0xed   : > { %2596 = vmatmul.mubr.msk.f32.vlgmr.msra.gmra.mrb[0].mxu0 %vm402_vm0, %v3578_v5 }
  0xee   : > { %2698 = vmatpush1.bf16.msra.mxu0 %v2697_v2  ;;  %1132 = vmatprep.mubr.f32.mxu0 %v3233_v0 }
  0xef   : > { %2701 = vmatprep.subr.msk.bf16.mxu0 %vm3477_vm8, %v2699_v41 }
  0xf1   : > { %2597 = vmatmul.mubr.msk.f32.gmra.mrb[2].mxu0 %vm402_vm0, %v3583_v45 }
  0xf2   : > { %1237 = vmatprep.mubr.f32.mxu0 %v3233_v0 }
  0xf5   : > { %2598 = vmatmul.mubr.msk.f32.vlgmr.msra.gmra.mrb[0].mxu0 %vm402_vm0, %v3592_v49 }
  0xf6   : > { %2704 = vmatpush1.bf16.msk.msra.mxu0 %vm3490_vm11, %v2702_v48  ;;  %1243 = vmatprep.mubr.f32.mxu0 %v3233_v0 }
  0xf9   : > { %2599 = vmatmul.mubr.msk.f32.gmra.mrb[2].mxu0 %vm402_vm0, %v3599_v50 }
  0xfa   : > { %1352 = vmatprep.mubr.f32.mxu0 %v3233_v0 }
  0xfd   : > { %2604 = vmatmul.mubr.msk.f32.vlgmr.msra.gmra.mrb[0].mxu0 %vm402_vm0, %v3604_v53 }
  0xfe   : > { %1358 = vmatprep.mubr.f32.mxu0 %v3233_v0 }
 0x101   : > { %2605 = vmatmul.mubr.msk.f32.gmra.mrb[2].mxu0 %vm402_vm0, %v3609_v55 }
 0x1d0   : > { %v1354_v3 = vpop.f32.mrb[0].mxu0 }
 0x1d1   : > { %v1379_v57 = vadd.f32 %v3613_v1, %v1354_v3  ;;  %v1356_v58 = vpop.f32.mrb[1].mxu0 }
 0x1d2   : > { %v1380_v59 = vadd.f32 %v3613_v1, %v1356_v58 }
 0x1d3   : > { %v3619_v4 = vmax.f32 %v1379_v57, 0.0 }
 0x1d4   : > { %v3621_v6 = vmax.f32 %v1380_v59, 0.0  ;;  %v1360_v7 = vpop.f32.mrb[2].mxu0 }
 0x1d5   : > { %v1381_v8 = vadd.f32 %v3617_v60, %v1360_v7  ;;  %v1362_v9 = vpop.f32.mrb[3].mxu0 }
 0x1d6   : > { %v1382_v10 = vadd.f32 %v3617_v60, %v1362_v9  ;;  %v3002_v11 = vpack.i.bf16 %v3621_v6, %v3619_v4  ;;  %v3062_v22 = vpack.i.bf16 %v3233_v0, %v3621_v6 }
 0x1d7   : > { %v3627_v12 = vmax.f32 %v1381_v8, 0.0 }
 0x1d8   : > { %v3629_v16 = vmax.f32 %v1382_v10, 0.0  ;;  %3003 = vrot.lane.b32.xlu1 %v3002_v11, %s3234_s18 }
 0x1d9   : > { %v3072_v18 = vpack.i.bf16 %v3627_v12, %v3619_v4  ;;  %v2729_v21 = vpack.c.bf16 %v3627_v12, %v3619_v4 }
 0x1da   : > { %v3007_v19 = vpack.i.bf16 %v3629_v16, %v3627_v12  ;;  %v2727_v20 = vpack.c.bf16 %v3629_v16, %v3621_v6  ;;  %v3067_v24 = vpack.i.bf16 %v3233_v0, %v3629_v16 }
 0x1dc   : > { %3008 = vrot.lane.b32.xlu0 %v3007_v19, %s3234_s18  ;;  %3013 = vrot.lane.b32.xlu1 %v3233_v0, %s3234_s18 }
 0x1e0   : > { %3018 = vrot.lane.b32.xlu0 %v3002_v11, %s3235_s21  ;;  %3023 = vrot.lane.b32.xlu1 %v3007_v19, %s3235_s21 }
 0x1e4   : > { %3028 = vrot.lane.b32.xlu0 %v3233_v0, %s3235_s21  ;;  %3033 = vrot.lane.b32.xlu1 %v3002_v11, %s3236_s22 }
 0x1e8   : > { %3038 = vrot.lane.b32.xlu0 %v3007_v19, %s3236_s22  ;;  %3043 = vrot.lane.b32.xlu1 %v3233_v0, %s3236_s22  ;;  %s284_s22 = sand.u32 1, %s3220_s25  }
 0x1e9   : > { %s3841_s16 = scalar_lea.sflag [#allocation5], %s284_s22 }
 0x1ec   : > { %3048 = vrot.lane.b32.xlu0 %v3002_v11, %s3237_s23  ;;  %3053 = vrot.lane.b32.xlu1 %v3007_v19, %s3237_s23 }
 0x1f0   : > { %3058 = vrot.lane.b32.xlu0 %v3233_v0, %s3237_s23  ;;  %3063 = vrot.lane.b32.xlu1 %v3062_v22, %s3238_s29  ;;  %s2561_s23 = sshll.u32 %s284_s22, 5 }
 0x1f4   : > { %3068 = vrot.lane.b32.xlu0 %v3067_v24, %s3238_s29  ;;  %3073 = vrot.lane.b32.xlu1 %v3072_v18, %s3238_s29  ;;  %s286_s29 = scalar_lea.vmem [#allocation6], %s2561_s23 }
 0x1f8   : > { %3078 = vrot.lane.b32.xlu0 %v3062_v22, %s3239_s8  ;;  %3083 = vrot.lane.b32.xlu1 %v3067_v24, %s3239_s8 }
 0x1fc   : > { %3088 = vrot.lane.b32.xlu0 %v3072_v18, %s3239_s8  ;;  %3093 = vrot.lane.b32.xlu1 %v3062_v22, %s3240_s9  ;;  %s2481_s8 = sshll.u32 %s286_s29, 4  ;;  %s3830_s8 = int_to_ptr.vmem [resolvable:$true] %s2481_s8 }
 0x1fd   : > { %s3162_s13 = scalar_lea.vmem %s3830_s8, 512 }
 0x1fe   : > { %p3163_p6 = scmp.ne.s32.totalorder %s3830_s8, %s3162_s13 }
 0x200   : > { %3098 = vrot.lane.b32.xlu0 %v3067_v24, %s3240_s9  ;;  %3103 = vrot.lane.b32.xlu1 %v3072_v18, %s3240_s9  ;;  %s2656_s9 = sshll.u32 %s3306_s28, 9  ;;  %p3164_p10 = pnand %p3163_p6, %p3913_p9 }
 0x201   : > { %s3839_s17 = scalar_lea.hbm %s3890_s7, %s2656_s9 }
 0x202   : > { %p3165_p12 = pneg %p3164_p10 }
 0x204   : > { %3108 = vrot.lane.b32.xlu0 %v3062_v22, %s3241_s14  ;;  %3113 = vrot.lane.b32.xlu1 %v3067_v24, %s3241_s14 }
 0x208   : > { %3118 = vrot.lane.b32.xlu0 %v3072_v18, %s3241_s14 }
 0x24a   : > { %v3004_v26 = vpop.permute.xlu1 %3003 }
 0x24b   : > { %v3006_v27 = vunpack.i.h.bf16 %v3004_v26  ;;  %v3005_v28 = vunpack.i.l.bf16 %v3004_v26 }
 0x24d   : > { %v1444_v37 = vsel %vm402_vm0, %v3005_v28, %v3006_v27 }
 0x24e   : > { %v3014_v29 = vpop.permute.xlu1 %3013  ;;  %v3009_v30 = vpop.permute.xlu0 %3008 }
 0x24f   : > { %v3016_v31 = vunpack.i.h.bf16 %v3014_v29  ;;  %v3015_v33 = vunpack.i.l.bf16 %v3014_v29  ;;  %v3011_v35 = vunpack.i.h.bf16 %v3009_v30  ;;  %v3010_v36 = vunpack.i.l.bf16 %v3009_v30 }
 0x251   : > { %v1446_v38 = vsel %vm402_vm0, %v3010_v36, %v3011_v35  ;;  %v1443_v40 = vsel %vm402_vm0, %v3015_v33, %v3005_v28  ;;  %v1445_v2 = vsel %vm402_vm0, %v3016_v31, %v3010_v36 }
 0x252   : > { %v3024_v41 = vpop.permute.xlu1 %3023  ;;  %v3019_v43 = vpop.permute.xlu0 %3018  ;;  %v2705_v44 = vpack.c.bf16 %v1446_v38, %v1444_v37  ;;  %v2707_v46 = vpack.c.bf16 %v1445_v2, %v1443_v40 }
 0x253   : > { %v3026_v47 = vunpack.i.h.bf16 %v3024_v41  ;;  %v3025_v48 = vunpack.i.l.bf16 %v3024_v41  ;;  %v3021_v3 = vunpack.i.h.bf16 %v3019_v43  ;;  %v3020_v57 = vunpack.i.l.bf16 %v3019_v43 }
 0x254   : > { %2706 = vmatprep.subr.bf16.mxu1 %v2705_v44 }
 0x255   : > { %v1418_v58 = vsel %vm372_vm1, %v3025_v48, %v3026_v47  ;;  %v1416_v59 = vsel %vm372_vm1, %v3020_v57, %v3021_v3  ;;  %2708 = vmatpush1.bf16.msra.mxu1 %v2707_v46 }
 0x256   : > { %v2709_v7 = vpack.c.bf16 %v1418_v58, %v1416_v59  ;;  %v3034_v8 = vpop.permute.xlu1 %3033  ;;  %v3029_v9 = vpop.permute.xlu0 %3028 }
 0x257   : > { %v3031_v10 = vunpack.i.h.bf16 %v3029_v9  ;;  %v3030_v11 = vunpack.i.l.bf16 %v3029_v9  ;;  %v3036_v18 = vunpack.i.h.bf16 %v3034_v8  ;;  %v3035_v19 = vunpack.i.l.bf16 %v3034_v8 }
 0x258   : > { %2606 = vmatmul.mubr.msk.f32.vlgmr.msra.gmra.mrb[0].mxu1 %vm402_vm0, %v3450_v51  ;;  %2711 = vmatprep.subr.msk.bf16.mxu1 %vm3455_vm5, %v2709_v7 }
 0x259   : > { %v1417_v22 = vsel %vm372_vm1, %v3031_v10, %v3025_v48  ;;  %v1415_v24 = vsel %vm372_vm1, %v3030_v11, %v3020_v57  ;;  %1527 = vmatprep.mubr.f32.mxu1 %v3233_v0  ;;  %v1630_v35 = vsel %vm593_vm4, %v3035_v19, %v3036_v18 }
 0x25a   : > { %v2712_v26 = vpack.c.bf16 %v1417_v22, %v1415_v24  ;;  %v3044_v27 = vpop.permute.xlu1 %3043  ;;  %v3039_v28 = vpop.permute.xlu0 %3038 }
 0x25b   : > { %v3046_v29 = vunpack.i.h.bf16 %v3044_v27  ;;  %v3045_v30 = vunpack.i.l.bf16 %v3044_v27  ;;  %v3041_v31 = vunpack.i.h.bf16 %v3039_v28  ;;  %v3040_v33 = vunpack.i.l.bf16 %v3039_v28 }
 0x25c   : > { %2607 = vmatmul.mubr.msk.f32.gmra.mrb[2].mxu1 %vm402_vm0, %v3475_v62 }
 0x25d   : > { %v1629_v51 = vsel %vm593_vm4, %v3045_v30, %v3035_v19  ;;  %v1631_v36 = vsel %vm593_vm4, %v3046_v29, %v3040_v33  ;;  %v1632_v37 = vsel %vm593_vm4, %v3040_v33, %v3041_v31  ;;  %2714 = vmatpush1.bf16.msk.msra.mxu1 %vm3462_vm6, %v2712_v26  ;;  %1604 = vmatprep.mubr.f32.mxu1 %v3233_v0 }
 0x25e   : > { %v2715_v38 = vpack.c.bf16 %v1632_v37, %v1630_v35  ;;  %v2718_v40 = vpack.c.bf16 %v1631_v36, %v1629_v51  ;;  %v3054_v2 = vpop.permute.xlu1 %3053  ;;  %v3049_v41 = vpop.permute.xlu0 %3048 }
 0x25f   : > { %v3056_v43 = vunpack.i.h.bf16 %v3054_v2  ;;  %v3055_v44 = vunpack.i.l.bf16 %v3054_v2  ;;  %v3051_v46 = vunpack.i.h.bf16 %v3049_v41  ;;  %v3050_v47 = vunpack.i.l.bf16 %v3049_v41 }
 0x260   : > { %2612 = vmatmul.mubr.msk.f32.vlgmr.msra.gmra.mrb[0].mxu1 %vm402_vm0, %v3488_v15  ;;  %2717 = vmatprep.subr.msk.bf16.mxu1 %vm3477_vm8, %v2715_v38 }
 0x261   : > { %v1745_v62 = vsel %vm708_vm10, %v3055_v44, %v3056_v43  ;;  %v1743_v48 = vsel %vm708_vm10, %v3050_v47, %v3051_v46  ;;  %2720 = vmatpush1.bf16.msk.msra.mxu1 %vm3490_vm11, %v2718_v40  ;;  %1610 = vmatprep.mubr.f32.mxu1 %v3233_v0 }
 0x262   : > { %v2721_v3 = vpack.c.bf16 %v1745_v62, %v1743_v48  ;;  %v3064_v57 = vpop.permute.xlu1 %3063  ;;  %v3059_v58 = vpop.permute.xlu0 %3058 }
 0x263   : > { %v3061_v59 = vunpack.i.h.bf16 %v3059_v58  ;;  %v3060_v7 = vunpack.i.l.bf16 %v3059_v58  ;;  %v3066_v22 = vunpack.i.h.bf16 %v3064_v57  ;;  %v3065_v24 = vunpack.i.l.bf16 %v3064_v57 }
 0x264   : > { %2613 = vmatmul.mubr.msk.f32.gmra.mrb[2].mxu1 %vm402_vm0, %v3501_v25  ;;  %2723 = vmatprep.subr.msk.bf16.mxu1 %vm3455_vm5, %v2721_v3 }
 0x265   : > { %v1744_v15 = vsel %vm708_vm10, %v3061_v59, %v3055_v44  ;;  %v1742_v8 = vsel %vm708_vm10, %v3060_v7, %v3050_v47  ;;  %1713 = vmatprep.mubr.f32.mxu1 %v3233_v0  ;;  %v1957_v27 = vsel %vm925_vm12, %v3065_v24, %v3066_v22 }
 0x266   : > { %v2724_v9 = vpack.c.bf16 %v1744_v15, %v1742_v8  ;;  %v3074_v10 = vpop.permute.xlu1 %3073  ;;  %v3069_v11 = vpop.permute.xlu0 %3068 }
 0x267   : > { %v3071_v18 = vunpack.i.h.bf16 %v3069_v11  ;;  %v3070_v19 = vunpack.i.l.bf16 %v3069_v11  ;;  %v3076_v28 = vunpack.i.h.bf16 %v3074_v10  ;;  %v3075_v29 = vunpack.i.l.bf16 %v3074_v10 }
 0x268   : > { %2618 = vmatmul.mubr.msk.f32.vlgmr.msra.gmra.mrb[0].mxu1 %vm402_vm0, %v3510_v32 }
 0x269   : > { %2726 = vmatpush1.bf16.msk.msra.mxu1 %vm3462_vm6, %v2724_v9  ;;  %1719 = vmatprep.mubr.f32.mxu1 %v3233_v0  ;;  %v1959_v32 = vsel %vm925_vm12, %v3070_v19, %v3071_v18  ;;  %v1956_v35 = vsel %vm925_vm12, %v3075_v29, %v3065_v24  ;;  %v1958_v51 = vsel %vm925_vm12, %v3076_v28, %v3070_v19  ;;  %v326_v28 = vld [vmem:[%s3886_s3 + $0x8] sm:$0xff] }
 0x26a   : > { %2728 = vmatprep.subr.bf16.mxu1 %v2727_v20  ;;  %v3079_v25 = vpop.permute.xlu0 %3078  ;;  %v3084_v26 = vpop.permute.xlu1 %3083  ;;  %v2731_v30 = vpack.c.bf16 %v1959_v32, %v1957_v27  ;;  %v2734_v12 = vpack.c.bf16 %v1958_v51, %v1956_v35 }
 0x26b   : > { %v3086_v6 = vunpack.i.h.bf16 %v3084_v26  ;;  %v3085_v16 = vunpack.i.l.bf16 %v3084_v26  ;;  %v3081_v20 = vunpack.i.h.bf16 %v3079_v25  ;;  %v3080_v33 = vunpack.i.l.bf16 %v3079_v25 }
 0x26c   : > { %2619 = vmatmul.mubr.msk.f32.gmra.mrb[2].mxu1 %vm402_vm0, %v3519_v39 }
 0x26d   : > { %1826 = vmatprep.mubr.f32.mxu1 %v3233_v0  ;;  %v2070_v36 = vsel %vm1040_vm13, %v3080_v33, %v3081_v20 }
 0x26e   : > { %v3089_v31 = vpop.permute.xlu0 %3088  ;;  %v3094_v39 = vpop.permute.xlu1 %3093 }
 0x26f   : > { %v3091_v37 = vunpack.i.h.bf16 %v3089_v31  ;;  %v3090_v38 = vunpack.i.l.bf16 %v3089_v31  ;;  %v3095_v43 = vunpack.i.l.bf16 %v3094_v39 }
 0x270   : > { %2624 = vmatmul.mubr.msk.f32.vlgmr.msra.gmra.mrb[0].mxu1 %vm402_vm0, %v3526_v42  ;;  %v2072_v42 = vsel %vm1040_vm13, %v3085_v16, %v3086_v6 }
 0x271   : > { %2730 = vmatpush1.bf16.msra.mxu1 %v2729_v21  ;;  %1832 = vmatprep.mubr.f32.mxu1 %v3233_v0  ;;  %v2737_v21 = vpack.c.bf16 %v2072_v42, %v2070_v36  ;;  %v2071_v44 = vsel %vm1040_vm13, %v3091_v37, %v3085_v16  ;;  %v2069_v46 = vsel %vm1040_vm13, %v3090_v38, %v3080_v33  ;;  %v2420_v36 = vshrl.u32 %v292_v13, 7 }
 0x272   : > { %2733 = vmatprep.subr.msk.bf16.mxu1 %vm3477_vm8, %v2731_v30  ;;  %v3099_v4 = vpop.permute.xlu0 %3098  ;;  %v3104_v40 = vpop.permute.xlu1 %3103  ;;  %v2740_v48 = vpack.c.bf16 %v2071_v44, %v2069_v46  ;;  %v331_v46 = vld [vmem:[%s3889_s6 + $0x8] sm:$0xff] }
 0x273   : > { %v3101_v2 = vunpack.i.h.bf16 %v3099_v4  ;;  %v3100_v41 = vunpack.i.l.bf16 %v3099_v4  ;;  %v3106_v52 = vunpack.i.h.bf16 %v3104_v40  ;;  %v3105_v57 = vunpack.i.l.bf16 %v3104_v40  ;;  %v327_v4 = vld [vmem:[%s3887_s4] sm:$0x1]  ;;  %v329_v40 = vld [vmem:[%s3888_s5 + $0x8] sm:$0xff] }
 0x274   : > { %2625 = vmatmul.mubr.msk.f32.gmra.mrb[2].mxu1 %vm402_vm0, %v3533_v54  ;;  %v3096_v54 = vunpack.i.h.bf16 %v3094_v39  ;;  %v2421_v37 = vsub.s32 0, %v2420_v36 }
 0x275   : > { %1915 = vmatprep.mubr.f32.mxu1 %v3233_v0  ;;  %v2186_v9 = vsel %vm1158_vm14, %v3106_v52, %v3100_v41 }
 0x276   : > { %v3114_v47 = vpop.permute.xlu1 %3113  ;;  %v3109_v62 = vpop.permute.xlu0 %3108  ;;  %v2185_v3 = vsel %vm1158_vm14, %v3095_v43, %v3096_v54 }
 0x277   : > { %v3116_v59 = vunpack.i.h.bf16 %v3114_v47  ;;  %v3115_v7 = vunpack.i.l.bf16 %v3114_v47  ;;  %v3111_v15 = vunpack.i.h.bf16 %v3109_v62  ;;  %v3110_v8 = vunpack.i.l.bf16 %v3109_v62 }
 0x278   : > { %2626 = vmatmul.mubr.msk.f32.vlgmr.msra.gmra.mrb[0].mxu1 %vm402_vm0, %v3544_v61  ;;  %v2187_v61 = vsel %vm1158_vm14, %v3100_v41, %v3101_v2  ;;  %v328_v2 = vld [vmem:[%s3888_s5] sm:$0xff] }
 0x279   : > { %2736 = vmatpush1.bf16.msk.msra.mxu1 %vm3490_vm11, %v2734_v12  ;;  %1921 = vmatprep.mubr.f32.mxu1 %v3233_v0  ;;  %v2743_v58 = vpack.c.bf16 %v2187_v61, %v2185_v3  ;;  %v2292_v10 = vsel %vm1266_vm15, %v3110_v8, %v3111_v15  ;;  %v330_v61 = vld [vmem:[%s3889_s6] sm:$0xff] }
 0x27a   : > { %2739 = vmatprep.subr.msk.bf16.mxu1 %vm3455_vm5, %v2737_v21  ;;  %v3119_v11 = vpop.permute.xlu0 %3118 }
 0x27b   : > { %v3121_v19 = vunpack.i.h.bf16 %v3119_v11  ;;  %v3120_v25 = vunpack.i.l.bf16 %v3119_v11 }
 0x27c   : > { %2627 = vmatmul.mubr.msk.f32.gmra.mrb[2].mxu1 %vm402_vm0, %v3551_v14  ;;  %v2184_v14 = vsel %vm1158_vm14, %v3105_v57, %v3095_v43 }
 0x27d   : > { %2040 = vmatprep.mubr.f32.mxu1 %v3233_v0  ;;  %v2745_v18 = vpack.c.bf16 %v2186_v9, %v2184_v14  ;;  %v2291_v22 = vsel %vm1266_vm15, %v3120_v25, %v3110_v8 }
 0x280   : > { %2632 = vmatmul.mubr.msk.f32.vlgmr.msra.gmra.mrb[0].mxu1 %vm402_vm0, %v3562_v23  ;;  %v2294_v23 = vsel %vm1266_vm15, %v3115_v7, %v3116_v59 }
 0x281   : > { %2742 = vmatpush1.bf16.msk.msra.mxu1 %vm3462_vm6, %v2740_v48  ;;  %2046 = vmatprep.mubr.f32.mxu1 %v3233_v0  ;;  %v2747_v56 = vpack.c.bf16 %v2294_v23, %v2292_v10 }
 0x282   : > { %2744 = vmatprep.subr.bf16.mxu1 %v2743_v58 }
 0x284   : > { %2633 = vmatmul.mubr.msk.f32.gmra.mrb[2].mxu1 %vm402_vm0, %v3569_v34  ;;  %v2293_v34 = vsel %vm1266_vm15, %v3121_v19, %v3115_v7  ;;  %v3130_v19 = vld [vmem:[%s3377_s20 + $0x10] sm:$0xff] }
 0x285   : > { %2153 = vmatprep.mubr.f32.mxu1 %v3233_v0  ;;  %v2750_v24 = vpack.c.bf16 %v2293_v34, %v2291_v22  ;;  %v3131_v34 = vld [vmem:[%s3377_s20 + $0x18] sm:$0xff] }
 0x288   : > { %2638 = vmatmul.mubr.msk.f32.vlgmr.msra.gmra.mrb[0].mxu1 %vm402_vm0, %v3578_v5 }
 0x289   : > { %2746 = vmatpush1.bf16.msra.mxu1 %v2745_v18  ;;  %2159 = vmatprep.mubr.f32.mxu1 %v3233_v0 }
 0x28a   : > { %2749 = vmatprep.subr.msk.bf16.mxu1 %vm3477_vm8, %v2747_v56 }
 0x28c   : > { %2639 = vmatmul.mubr.msk.f32.gmra.mrb[2].mxu1 %vm402_vm0, %v3583_v45 }
 0x28d   : > { %2262 = vmatprep.mubr.f32.mxu1 %v3233_v0 }
 0x290   : > { %2640 = vmatmul.mubr.msk.f32.vlgmr.msra.gmra.mrb[0].mxu1 %vm402_vm0, %v3592_v49 }
 0x291   : > { %2752 = vmatpush1.bf16.msk.msra.mxu1 %vm3490_vm11, %v2750_v24  ;;  %2268 = vmatprep.mubr.f32.mxu1 %v3233_v0  ;;  %v3132_v24 = vld [vmem:[%s3377_s20] sm:$0xff] }
 0x294   : > { %2641 = vmatmul.mubr.msk.f32.gmra.mrb[2].mxu1 %vm402_vm0, %v3599_v50 }
 0x295   : > { %2375 = vmatprep.mubr.f32.mxu1 %v3233_v0 }
 0x298   : > { %2646 = vmatmul.mubr.msk.f32.vlgmr.msra.gmra.mrb[0].mxu1 %vm402_vm0, %v3604_v53 }
 0x299   : > { %2381 = vmatprep.mubr.f32.mxu1 %v3233_v0 }
 0x29c   : > { %2647 = vmatmul.mubr.msk.f32.gmra.mrb[2].mxu1 %vm402_vm0, %v3609_v55  ;;  %vm2407_vm0 = vcmask 31744  }
 0x36b   : > { %v2377_v63 = vpop.f32.mrb[0].mxu1 }
 0x36c   : > { %v3787_v5 = vadd.f32 %v2377_v63, %v3613_v1  ;;  %v2379_v17 = vpop.f32.mrb[1].mxu1 }
 0x36d   : > { %v3790_v45 = vadd.f32 %v2379_v17, %v3613_v1  ;;  %v325_v1 = vld [vmem:[%s3886_s3] sm:$0xff]  ;;  %v3133_v17 = vld [vmem:[%s3377_s20 + $0x8] sm:$0xff]  ;;  %s3166_s20 = sshll.u32 %s3243_s15, 4  ;;  %s3167_s20 = int_to_ptr.vmem [resolvable:$false] %s3166_s20 }
 0x36e   : > { %s3168_s19 = scalar_lea.vmem %s3167_s20, 1024  ;;  %p3169_p2 = scmp.lt.s32.totalorder %s3830_s8, %s3167_s20 }
 0x36f   : > { %v2383_v49 = vpop.f32.mrb[2].mxu1  ;;  %v2396_v50 = vadd.f32 %v3790_v45, %v3787_v5  ;;  %p3170_p3 = scmp.lt.s32.totalorder %s3168_s19, %s3162_s13 }
 0x370   : > { %v3795_v26 = vadd.f32 %v2383_v49, %v3617_v60  ;;  %v2385_v53 = vpop.f32.mrb[3].mxu1 }
 0x371   : > { %v2395_v0 = vadd.f32 %v2385_v53, %v3617_v60  ;;  %2397 = vadd.xlane.f32.xlu1 %v2396_v50  ;;  %p3171_p4 = por %p3170_p3, %p3169_p2 }
 0x373   : > { %v2399_v55 = vadd.f32 %v2395_v0, %v3795_v26  ;;  %p3172_p7 = pnand %p3171_p4, %p3165_p12 }
 0x375   : > { %2400 = vadd.xlane.f32.xlu0 %v2399_v55 }
 0x3fe   : > { %v2398_v32 = vpop.xlane.xlu1 %2397 }
 0x3ff   : > { %v2403_v27 = vmul.f32 0.00390625, %v2398_v32 }
 0x401   : > { %v2405_v30 = vmul.f32 %v2403_v27, %v325_v1 }
 0x402   : > { %v2401_v29 = vpop.xlane.xlu0 %2400 }
 0x403   : > { %v2404_v31 = vmul.f32 0.00390625, %v2401_v29  ;;  %v2408_v60 = vsel %vm2407_vm0, %v2405_v30, 0.0 }
 0x405   : > { %v2406_v6 = vmul.f32 %v2404_v31, %v326_v28 }
 0x407   : > { %v2409_v16 = vsel %vm2407_vm0, %v2406_v6, 0.0 }
 0x408   : > { %v2410_v20 = vadd.f32 %v2409_v16, %v2408_v60 }
 0x40a   : > { %v2411_v33 = vrot.slane %v2410_v20, 4 }
 0x40c   : > { %v2412_v39 = vadd.f32 %v2411_v33, %v2410_v20 }
 0x40e   : > { %v2413_v35 = vrot.slane %v2412_v39, 2 }
 0x410   : > { %v2414_v51 = vadd.f32 %v2413_v35, %v2412_v39 }
 0x412   : > { %v2415_v42 = vrot.slane %v2414_v51, 1 }
 0x414   : > { %v2416_v12 = vadd.f32 %v2415_v42, %v2414_v51 }
 0x416   : > { %v2417_v21 = vadd.f32 %v2416_v12, %v327_v4 }
 0x418   : > { %v2418_v38 = vmax.f32 %v2417_v21, 0.0 }
 0x41a   : > { %v2422_v41 = vrot.slane %v2418_v38, %v2421_v37 }
 0x41c   : > { %v2424_v54 = vmul.f32 %v2422_v41, %v329_v40  ;;  %v2423_v43 = vmul.f32 %v2422_v41, %v328_v2 }
 0x41e   : > { %v2428_v13 = vsel %vm2407_vm0, %v2424_v54, 0.0  ;;  %v2425_v44 = vsel %vm2407_vm0, %v2423_v43, 0.0 }
 0x41f   : > { %2429 = vadd.xlane.f32.xlu1 %v2428_v13  ;;  %2426 = vadd.xlane.f32.xlu0 %v2425_v44 }
 0x4ac   : > { %v2430_v47 = vpop.xlane.xlu1 %2429  ;;  %v2427_v62 = vpop.xlane.xlu0 %2426 }
 0x4ad   : > { %v2432_v48 = vadd.f32 %v2430_v47, %v331_v46  ;;  %v2431_v3 = vadd.f32 %v2427_v62, %v330_v61 }
 0x4af   : > { %v2649_v52 = vmul.f32 -1.442695, %v2432_v48  ;;  %v2648_v57 = vmul.f32 -1.442695, %v2431_v3 }
 0x4b1   : > { %3122 = vpow2.f32 %v2649_v52 }
 0x4b2   : > { %3124 = vpow2.f32 %v2648_v57 }
 0x4bb   : > { %v3123_v58 = vpop.eup %3122 }
 0x4bc   : > { %v3125_v59 = vpop.eup %3124  ;;  %v2440_v7 = vadd.f32 1.0, %v3123_v58 }
 0x4bd   : > { %v2439_v15 = vadd.f32 1.0, %v3125_v59 }
 0x4be   : > { %3126 = vrcp.f32 %v2440_v7 }
 0x4bf   : > { %3128 = vrcp.f32 %v2439_v15 }
 0x4c8   : > { %v3127_v8 = vpop.eup %3126 }
 0x4c9   : > { %v3129_v14 = vpop.eup %3128  ;;  %2452 = vperm.xlu1 %3001, %v3127_v8  }
 0x4ca   : > { %2447 = vperm.xlu0 %3000, %v3129_v14  }
 0x548   : > { %v2453_v9 = vpop.permute.xlu1 %2452 }
 0x549   : > { %v2457_v23 = vmul.f32 %v2453_v9, %v3795_v26  ;;  %v2458_v10 = vmul.f32 %v2453_v9, %v2395_v0  ;;  %v2448_v11 = vpop.permute.xlu0 %2447 }
 0x54a   : > { %v2455_v18 = vmul.f32 %v2448_v11, %v3787_v5  ;;  %v2456_v56 = vmul.f32 %v2448_v11, %v3790_v45 }
 0x54b   : > { %v2461_v25 = vadd.f32 %v3130_v19, %v2457_v23  ;;  %v2462_v22 = vadd.f32 %v3131_v34, %v2458_v10 }
 0x54c   : > { %v2459_v63 = vadd.f32 %v3132_v24, %v2455_v18  ;;  %v2460_v49 = vadd.f32 %v3133_v17, %v2456_v56 }
 0x54d   : > { %2465 = vst [vmem:[%s286_s29 + $0x10] sm:$0xff] %v2461_v25  ;;  %2466 = vst [vmem:[%s286_s29 + $0x18] sm:$0xff] %v2462_v22 }
 0x54e   : > { %2463 = vst [vmem:[%s286_s29] sm:$0xff] %v2459_v63  ;;  %2464 = vst [vmem:[%s286_s29 + $0x8] sm:$0xff] %v2460_v49 }
 0x54f   : > { %3175 = shalt.err (!%p3172_p7)
}
 0x550   : > { %s3176_s21 = scalar_lea.hbm %s3839_s17, 512  ;;  %s3180_s29 = scalar_lea.hbm %s3890_s7, 1024 }
 0x551   : > { %p3177_p8 = scmp.ne.s32.totalorder %s3839_s17, %s3176_s21  ;;  %p3181_p1 = scmp.lt.u32.totalorder %s3839_s17, %s3890_s7 }
 0x552   : > { %p3182_p0 = scmp.lt.u32.totalorder %s3180_s29, %s3176_s21  ;;  %p3184_p6 = scmp.lt.u32.totalorder %s3176_s21, %s3839_s17 }
 0x553   : > { %p3178_p11 = pnand %p3177_p8, %p3913_p9 }
 0x554   : > { %p3183_p5 = por %p3182_p0, %p3181_p1 }
 0x555   : > { %p3179_p13 = pneg %p3178_p11 }
 0x556   : > { %p3185_p10 = por %p3184_p6, %p3183_p5 }
 0x558   : > { %p3186_p12 = pnand %p3185_p10, %p3179_p13 }
 0x55a   : > { %3189 = shalt.err (!%p3186_p12)
}
 0x55b   : > { %s3244_s28 = smov 256  }
 0x55c   : > { %2821 = dma.vmem_to_hbm [thread:$0]  (%p3913_p9), %s3830_s8, 512, %s3839_s17, %s3841_s16, %s3244_s28, %s3244_s28, %s3234_s18  }
 0x55d PF: > { %p2833_p2 = scmp.ge.s32.totalorder %s3228_s27, 2  ;;  %s2496_s13 = sand.u32 1, %s3216_s24  }
 0x55e   : > { %p3914_p3 = scmp.ne.s32.totalorder %s3895_s12, 0  ;;  %s2497_s15 = scalar_lea.sflag [#allocation5], %s2496_s13 }
 0x560   : > { %p2828_p4 = pnand %p2833_p2, %p3914_p3 }
 0x562   : > { %3211 = dma.done.wait (!%p2828_p4), %s2497_s15, 512  }
 0x563   : > { %3213 = vsyncadd (!%p2828_p4), %s2497_s15, 4294966784  ;;  %p18_p7 = scmp.ge.s32.totalorder %s3310_s30, 4   ;;  %s3915_s24 = smov %s3220_s25 }
 0x564   : > { %s3916_s25 = smov %s3224_s26  ;;  %s3917_s26 = smov %s3321_s10 }
 0x565   : > { %s3918_s27 = smov %s3310_s30  ;;  %20 = sbr.rel (!%p18_p7) target bundleno = 4 (0x4), region = 96 }
 0x56c   :  { %2502 = vsyncpa [#allocation4], 1 }
 0x56d   :  { %2504 = vsyncpa [#allocation4 + $0x1], 1 }
 0x56e   :  { %2505 = vsyncpa [#allocation5], 1 }
 0x56f   :  { %2507 = vsyncpa [#allocation5 + $0x1], 1 }

</bundles_post_ra>
